<compile_context>
chip_gen: v5e
topology: v5e:2x2
jax: 0.10.0
libtpu: 0.0.40
codegen_flags: <defaults>
</compile_context>

<pallas_src>
import jax
import jax.numpy as jnp
from jax import lax
from jax.experimental import pallas as pl
from jax.experimental.pallas import tpu as pltpu

LN_EPS = 1e-5
BN_EPS = 1e-5
_INV_SQRT2 = 0.7071067811865476


def _gelu_exact(x):
    # nn.GELU() default (approximate='none'): 0.5 * x * (1 + erf(x / sqrt(2)))
    return 0.5 * x * (1.0 + lax.erf(x * _INV_SQRT2))


def binary_rnn_kernel(x_ref, w_mxu_ref, w_vpu_ref, vecs_ref, tail_ref, out_ref):
    B, D = x_ref.shape
    L = w_vpu_ref.shape[0] // 2
    R = w_vpu_ref.shape[-1]

    # --- fc: (B, D) @ (D, R) + b_fc   (bf16 MXU operands, f32 accumulate) ---
    w_fc = w_mxu_ref[0][:D, :R]                                   # bf16 (D, R)
    h = jnp.dot(x_ref[...].astype(jnp.bfloat16), w_fc,
                preferred_element_type=jnp.float32) + vecs_ref[0]

    # --- SimpleRNN stack (statically unrolled over layers) ---
    for l in range(L):
        # LayerNorm over the feature axis (f32, biased variance as in PyTorch).
        mu = jnp.mean(h, axis=-1, keepdims=True)
        var = jnp.mean((h - mu) * (h - mu), axis=-1, keepdims=True)
        hn = (h - mu) * lax.rsqrt(var + LN_EPS)
        hn = hn * vecs_ref[1 + 3 * l] + vecs_ref[2 + 3 * l]
        hg = _gelu_exact(hn)                                      # exact erf GELU

        # Hoisted input-to-hidden matmul + folded bias (b_ih + b_hh):
        # one batched (B,R)@(R,R) bf16 MXU matmul per layer.
        w_ih = w_mxu_ref[1 + l][:R, :R]                           # bf16 (R, R)
        pre = (jnp.dot(hg.astype(jnp.bfloat16), w_ih,
                       preferred_element_type=jnp.float32)
               + vecs_ref[3 + 3 * l])                             # (B, R) f32
        # Columns of pre for the column-layout chain: one XLU transpose per
        # layer, off the row-chain critical path.
        pre_t = jnp.transpose(pre)                                # (R, B)

        # Serial Elman recurrence over the batch axis:
        #   h_t = tanh(pre[t] + h_{t-1} @ w_hh),  h_{-1} = 0.
        # Per-step matvec on VPU+XLU in f32 (no MXU round-trip).  Both layouts
        # of the state are carried; each step's row form comes from the column
        # form and vice versa, so no per-step transpose is needed.
        w_hh = w_vpu_ref[2 * l]                                   # (R, R) f32
        w_hh_t = w_vpu_ref[2 * l + 1]                             # (R, R) f32
        h_row = jnp.zeros((1, R), jnp.float32)
        h_col = jnp.zeros((R, 1), jnp.float32)
        rows = []
        # Fully unrolled: B*R = 8*32 keeps everything comfortably in vregs.
        # Before scaling B or R up, switch to lax.fori_loop(unroll=True) chunks
        # writing into a (B,R) VMEM scratch (64-vreg cliff).
        for t in range(B):
            # s_row[j] = sum_k h[k] * w_hh[k, j]   (sublane reduce)
            s_row = jnp.sum(h_col * w_hh, axis=0, keepdims=True)      # (1, R)
            # s_col[i] = sum_k h[k] * w_hh[k, i]   (lane reduce)
            s_col = jnp.sum(h_row * w_hh_t, axis=1, keepdims=True)    # (R, 1)
            h_row = jnp.tanh(pre[t:t + 1, :] + s_row)
            h_col = jnp.tanh(pre_t[:, t:t + 1] + s_col)
            rows.append(h_row)
        # SimpleRNN dropout: identity in eval mode.
        h = jnp.concatenate(rows, axis=0)                         # (B, R)

    # --- fc1 (bf16 MXU) + BatchNorm1d folded to one FMA + GELU ---
    w_fc1 = w_mxu_ref[1 + L][:R, :D]                              # bf16 (R, D)
    y = jnp.dot(h.astype(jnp.bfloat16), w_fc1,
                preferred_element_type=jnp.float32) + tail_ref[0]
    y = y * tail_ref[1] + tail_ref[2]                             # eval BatchNorm
    y = _gelu_exact(y)
    # --- fc2 as VPU multiply + lane reduce; dropout = identity; sigmoid ---
    z = jnp.sum(y * tail_ref[3], axis=-1, keepdims=True) + tail_ref[4][:, :1]
    out_ref[...] = jax.nn.sigmoid(z)


def pack_params(p):
    """One-time constant folding + packing of the 17 PyTorch-style arrays into
    4 kernel inputs (fewer, larger HBM->VMEM DMAs)."""
    L, R, _ = p["w_ih"].shape
    D = p["w_fc"].shape[0]
    S = max(D, R)   # slot size; keeps every weight at a tile-aligned offset

    def slot(a):
        return jnp.zeros((S, S), jnp.float32).at[:a.shape[0], :a.shape[1]].set(a)

    # bf16 MXU-weight pack: [w_fc, w_ih_0..w_ih_{L-1}, w_fc1] (x @ W layouts).
    w_mxu = jnp.stack([slot(p["w_fc"])]
                      + [slot(p["w_ih"][l]) for l in range(L)]
                      + [slot(p["w_fc1"])]).astype(jnp.bfloat16)        # (L+2,S,S)

    # f32 recurrent weights for the VPU path: per layer [w_hh, w_hh^T].
    w_vpu = jnp.stack([m for l in range(L)
                       for m in (p["w_hh"][l], p["w_hh"][l].T)])        # (2L,R,R)

    # f32 R-width vectors: [b_fc] + per layer [ln_g, ln_b, b_ih + b_hh].
    vec_rows = [p["b_fc"]]
    for l in range(L):
        vec_rows += [p["ln_g"][l], p["ln_b"][l], p["b_ih"][l] + p["b_hh"][l]]
    vecs = jnp.stack(vec_rows)                                          # (1+3L,1,R)

    # f32 D-width tail: [b_fc1, bn_scale, bn_shift, w_fc2^T, b_fc2 (bcast)].
    bn_scale = p["bn_g"] * lax.rsqrt(p["bn_v"] + BN_EPS)
    bn_shift = p["bn_b"] - p["bn_m"] * bn_scale
    b_fc2_row = jnp.full((1, D), p["b_fc2"][0, 0], jnp.float32)
    tail = jnp.stack([p["b_fc1"], bn_scale, bn_shift,
                      p["w_fc2"].T, b_fc2_row])                         # (5,1,D)

    return dict(w_mxu=w_mxu, w_vpu=w_vpu, vecs=vecs, tail=tail)


def binary_rnn_forward(x, packed):
    B = x.shape[0]
    args = [x, packed["w_mxu"], packed["w_vpu"], packed["vecs"], packed["tail"]]
    vmem = pl.BlockSpec(memory_space=pltpu.MemorySpace.VMEM)
    # Single-block, no-grid call: total resident data is tens of KB, far under
    # VMEM on v5e/v6e/v7x.  If this model is ever scaled up, first raise
    # vmem_limit_bytes via pltpu.CompilerParams, and only then add a
    # batch-chunk grid ("arbitrary" semantics, h carried in scratch).
    return pl.pallas_call(
        binary_rnn_kernel,
        out_shape=jax.ShapeDtypeStruct((B, 1), jnp.float32),
        in_specs=[vmem] * len(args),
        out_specs=vmem,
    )(*args)


def init_params(key, n_rnn_layers, input_size, rnn_dim):
    ks = jax.random.split(key, 16)

    def rnd(k, shape, scale=0.1):
        return scale * jax.random.normal(k, shape, dtype=jnp.float32)

    # NOTE: w_ih / w_hh are stored pre-transposed relative to PyTorch's
    # nn.RNN (hidden, input) layout so x_t @ w_ih is correct.
    return dict(
        w_fc=rnd(ks[0], (input_size, rnn_dim)),
        b_fc=rnd(ks[1], (1, rnn_dim)),
        ln_g=1.0 + rnd(ks[2], (n_rnn_layers, 1, rnn_dim)),
        ln_b=rnd(ks[3], (n_rnn_layers, 1, rnn_dim)),
        w_ih=rnd(ks[4], (n_rnn_layers, rnn_dim, rnn_dim)),
        w_hh=rnd(ks[5], (n_rnn_layers, rnn_dim, rnn_dim)),
        b_ih=rnd(ks[6], (n_rnn_layers, 1, rnn_dim)),
        b_hh=rnd(ks[7], (n_rnn_layers, 1, rnn_dim)),
        w_fc1=rnd(ks[8], (rnn_dim, input_size)),
        b_fc1=rnd(ks[9], (1, input_size)),
        bn_g=1.0 + rnd(ks[10], (1, input_size)),
        bn_b=rnd(ks[11], (1, input_size)),
        bn_m=rnd(ks[12], (1, input_size)),
        bn_v=1.0 + 0.1 * jnp.abs(jax.random.normal(ks[13], (1, input_size),
                                                   jnp.float32)),
        w_fc2=rnd(ks[14], (input_size, 1)),
        b_fc2=rnd(ks[15], (1, 1)),
    )


def binary_rnn_reference(x, p):
    """Pure-JAX f32 reference mirroring the PyTorch forward (eval mode)."""
    h = x @ p["w_fc"] + p["b_fc"]
    R = p["w_fc"].shape[1]
    for l in range(p["w_ih"].shape[0]):
        mu = jnp.mean(h, -1, keepdims=True)
        var = jnp.mean((h - mu) ** 2, -1, keepdims=True)
        hn = (h - mu) / jnp.sqrt(var + LN_EPS) * p["ln_g"][l] + p["ln_b"][l]
        hg = _gelu_exact(hn)

        def step(h_prev, x_t):
            h_new = jnp.tanh(x_t @ p["w_ih"][l] + p["b_ih"][l][0]
                             + h_prev @ p["w_hh"][l] + p["b_hh"][l][0])
            return h_new, h_new

        _, h = lax.scan(step, jnp.zeros((R,), jnp.float32), hg)
    y = h @ p["w_fc1"] + p["b_fc1"]
    y = (y - p["bn_m"]) / jnp.sqrt(p["bn_v"] + BN_EPS) * p["bn_g"] + p["bn_b"]
    y = _gelu_exact(y)
    return jax.nn.sigmoid(y @ p["w_fc2"] + p["b_fc2"])


if __name__ == "__main__":
    n_rnn_layers = 2
    input_size = 16
    rnn_dim = 32
    batch = 8

    key = jax.random.PRNGKey(0)
    kx, kp = jax.random.split(key)
    x = jax.random.normal(kx, (batch, input_size), dtype=jnp.float32)
    params = init_params(kp, n_rnn_layers, input_size, rnn_dim)
    packed = pack_params(params)   # constant folding + DMA packing, done once

    out = jax.block_until_ready(binary_rnn_forward(x, packed))

    ref = binary_rnn_reference(x, params)
    assert out.shape == (batch, 1), out.shape
    # bf16 MXU operands consume a little tolerance budget vs. the f32 reference.
    assert jnp.allclose(out, ref, atol=3e-3, rtol=3e-3), (out, ref)

    print("KERNEL_OK")
</pallas_src>

<mosaic_0001>
module attributes {stable_mosaic.version = 11 : i64} {
  func.func @binary_rnn_kernel(%arg0: memref<8x16xf32, #tpu.memory_space<vmem>>, %arg1: memref<4x32x32xbf16, #tpu.memory_space<vmem>>, %arg2: memref<4x32x32xf32, #tpu.memory_space<vmem>>, %arg3: memref<7x1x32xf32, #tpu.memory_space<vmem>>, %arg4: memref<5x1x16xf32, #tpu.memory_space<vmem>>, %arg5: memref<8x1xf32, #tpu.memory_space<vmem>>) attributes {dimension_semantics = [], scalar_prefetch = 0 : i64, scratch_operands = 0 : i64, tpu.core_type = #tpu.core_type<tc>} {
    %c0 = arith.constant 0 : index
    %c0_0 = arith.constant 0 : index
    %c0_1 = arith.constant 0 : index
    %0 = vector.load %arg1[%c0, %c0_0, %c0_1] : memref<4x32x32xbf16, #tpu.memory_space<vmem>>, vector<1x32x32xbf16>
    %1 = vector.shape_cast %0 : vector<1x32x32xbf16> to vector<32x32xbf16>
    %2 = vector.extract_strided_slice %1 {offsets = [0, 0], sizes = [16, 32], strides = [1, 1]} : vector<32x32xbf16> to vector<16x32xbf16>
    %c0_2 = arith.constant 0 : index
    %c0_3 = arith.constant 0 : index
    %3 = vector.load %arg0[%c0_2, %c0_3] : memref<8x16xf32, #tpu.memory_space<vmem>>, vector<8x16xf32>
    %4 = arith.truncf %3 : vector<8x16xf32> to vector<8x16xbf16>
    %cst = arith.constant dense<0.000000e+00> : vector<8x32xf32>
    %5 = tpu.matmul %4, %2, %cst {dimension_numbers = #tpu.dot_dimension_numbers<[1], [0], [0], [1], [0, 0, 1, 1], [], []>} : vector<8x16xbf16>, vector<16x32xbf16>, vector<8x32xf32> -> vector<8x32xf32>
    %c0_4 = arith.constant 0 : index
    %c0_5 = arith.constant 0 : index
    %c0_6 = arith.constant 0 : index
    %6 = vector.load %arg3[%c0_4, %c0_5, %c0_6] : memref<7x1x32xf32, #tpu.memory_space<vmem>>, vector<1x1x32xf32>
    %7 = vector.shape_cast %6 : vector<1x1x32xf32> to vector<1x32xf32>
    %8 = vector.broadcast %7 : vector<1x32xf32> to vector<8x32xf32>
    %9 = arith.addf %5, %8 : vector<8x32xf32>
    %cst_7 = arith.constant dense<0.000000e+00> : vector<8xf32>
    %10 = vector.multi_reduction <add>, %9, %cst_7 [1] : vector<8x32xf32> to vector<8xf32>
    %11 = vector.shape_cast %10 : vector<8xf32> to vector<8x1xf32>
    %cst_8 = arith.constant 3.200000e+01 : f32
    %12 = vector.broadcast %cst_8 : f32 to vector<8x1xf32>
    %13 = arith.divf %11, %12 : vector<8x1xf32>
    %14 = vector.broadcast %13 : vector<8x1xf32> to vector<8x32xf32>
    %15 = arith.subf %9, %14 : vector<8x32xf32>
    %16 = vector.broadcast %13 : vector<8x1xf32> to vector<8x32xf32>
    %17 = arith.subf %9, %16 : vector<8x32xf32>
    %18 = arith.mulf %15, %17 : vector<8x32xf32>
    %cst_9 = arith.constant dense<0.000000e+00> : vector<8xf32>
    %19 = vector.multi_reduction <add>, %18, %cst_9 [1] : vector<8x32xf32> to vector<8xf32>
    %20 = vector.shape_cast %19 : vector<8xf32> to vector<8x1xf32>
    %cst_10 = arith.constant 3.200000e+01 : f32
    %21 = vector.broadcast %cst_10 : f32 to vector<8x1xf32>
    %22 = arith.divf %20, %21 : vector<8x1xf32>
    %23 = vector.broadcast %13 : vector<8x1xf32> to vector<8x32xf32>
    %24 = arith.subf %9, %23 : vector<8x32xf32>
    %cst_11 = arith.constant 9.99999974E-6 : f32
    %25 = vector.broadcast %cst_11 : f32 to vector<8x1xf32>
    %26 = arith.addf %22, %25 : vector<8x1xf32>
    %27 = math.rsqrt %26 : vector<8x1xf32>
    %28 = vector.broadcast %27 : vector<8x1xf32> to vector<8x32xf32>
    %29 = arith.mulf %24, %28 : vector<8x32xf32>
    %c1 = arith.constant 1 : index
    %c0_12 = arith.constant 0 : index
    %c0_13 = arith.constant 0 : index
    %30 = vector.load %arg3[%c1, %c0_12, %c0_13] : memref<7x1x32xf32, #tpu.memory_space<vmem>>, vector<1x1x32xf32>
    %31 = vector.shape_cast %30 : vector<1x1x32xf32> to vector<1x32xf32>
    %32 = vector.broadcast %31 : vector<1x32xf32> to vector<8x32xf32>
    %33 = arith.mulf %29, %32 : vector<8x32xf32>
    %c2 = arith.constant 2 : index
    %c0_14 = arith.constant 0 : index
    %c0_15 = arith.constant 0 : index
    %34 = vector.load %arg3[%c2, %c0_14, %c0_15] : memref<7x1x32xf32, #tpu.memory_space<vmem>>, vector<1x1x32xf32>
    %35 = vector.shape_cast %34 : vector<1x1x32xf32> to vector<1x32xf32>
    %36 = vector.broadcast %35 : vector<1x32xf32> to vector<8x32xf32>
    %37 = arith.addf %33, %36 : vector<8x32xf32>
    %cst_16 = arith.constant 5.000000e-01 : f32
    %38 = vector.broadcast %cst_16 : f32 to vector<8x32xf32>
    %39 = arith.mulf %38, %37 : vector<8x32xf32>
    %cst_17 = arith.constant 0.707106769 : f32
    %40 = vector.broadcast %cst_17 : f32 to vector<8x32xf32>
    %41 = arith.mulf %37, %40 : vector<8x32xf32>
    %42 = math.erf %41 : vector<8x32xf32>
    %cst_18 = arith.constant 1.000000e+00 : f32
    %43 = vector.broadcast %cst_18 : f32 to vector<8x32xf32>
    %44 = arith.addf %43, %42 : vector<8x32xf32>
    %45 = arith.mulf %39, %44 : vector<8x32xf32>
    %c1_19 = arith.constant 1 : index
    %c0_20 = arith.constant 0 : index
    %c0_21 = arith.constant 0 : index
    %46 = vector.load %arg1[%c1_19, %c0_20, %c0_21] : memref<4x32x32xbf16, #tpu.memory_space<vmem>>, vector<1x32x32xbf16>
    %47 = vector.shape_cast %46 : vector<1x32x32xbf16> to vector<32x32xbf16>
    %48 = arith.truncf %45 : vector<8x32xf32> to vector<8x32xbf16>
    %cst_22 = arith.constant dense<0.000000e+00> : vector<8x32xf32>
    %49 = tpu.matmul %48, %47, %cst_22 {dimension_numbers = #tpu.dot_dimension_numbers<[1], [0], [0], [1], [0, 0, 1, 1], [], []>} : vector<8x32xbf16>, vector<32x32xbf16>, vector<8x32xf32> -> vector<8x32xf32>
    %c3 = arith.constant 3 : index
    %c0_23 = arith.constant 0 : index
    %c0_24 = arith.constant 0 : index
    %50 = vector.load %arg3[%c3, %c0_23, %c0_24] : memref<7x1x32xf32, #tpu.memory_space<vmem>>, vector<1x1x32xf32>
    %51 = vector.shape_cast %50 : vector<1x1x32xf32> to vector<1x32xf32>
    %52 = vector.broadcast %51 : vector<1x32xf32> to vector<8x32xf32>
    %53 = arith.addf %49, %52 : vector<8x32xf32>
    %54 = tpu.transpose %53, [1, 0] : vector<8x32xf32> -> vector<32x8xf32>
    %c0_25 = arith.constant 0 : index
    %c0_26 = arith.constant 0 : index
    %c0_27 = arith.constant 0 : index
    %55 = vector.load %arg2[%c0_25, %c0_26, %c0_27] : memref<4x32x32xf32, #tpu.memory_space<vmem>>, vector<1x32x32xf32>
    %56 = vector.shape_cast %55 : vector<1x32x32xf32> to vector<32x32xf32>
    %c1_28 = arith.constant 1 : index
    %c0_29 = arith.constant 0 : index
    %c0_30 = arith.constant 0 : index
    %57 = vector.load %arg2[%c1_28, %c0_29, %c0_30] : memref<4x32x32xf32, #tpu.memory_space<vmem>>, vector<1x32x32xf32>
    %58 = vector.shape_cast %57 : vector<1x32x32xf32> to vector<32x32xf32>
    %cst_31 = arith.constant 0.000000e+00 : f32
    %59 = vector.broadcast %cst_31 : f32 to vector<1x32xf32>
    %cst_32 = arith.constant 0.000000e+00 : f32
    %60 = vector.broadcast %cst_32 : f32 to vector<32x1xf32>
    %61 = vector.broadcast %60 : vector<32x1xf32> to vector<32x32xf32>
    %62 = arith.mulf %61, %56 : vector<32x32xf32>
    %cst_33 = arith.constant dense<0.000000e+00> : vector<32xf32>
    %63 = vector.multi_reduction <add>, %62, %cst_33 [0] : vector<32x32xf32> to vector<32xf32>
    %64 = vector.shape_cast %63 : vector<32xf32> to vector<1x32xf32>
    %65 = vector.broadcast %59 : vector<1x32xf32> to vector<32x32xf32>
    %66 = arith.mulf %65, %58 : vector<32x32xf32>
    %cst_34 = arith.constant dense<0.000000e+00> : vector<32xf32>
    %67 = vector.multi_reduction <add>, %66, %cst_34 [1] : vector<32x32xf32> to vector<32xf32>
    %68 = vector.shape_cast %67 : vector<32xf32> to vector<32x1xf32>
    %69 = vector.extract_strided_slice %53 {offsets = [0, 0], sizes = [1, 32], strides = [1, 1]} : vector<8x32xf32> to vector<1x32xf32>
    %70 = arith.addf %69, %64 : vector<1x32xf32>
    %71 = math.tanh %70 : vector<1x32xf32>
    %72 = vector.extract_strided_slice %54 {offsets = [0, 0], sizes = [32, 1], strides = [1, 1]} : vector<32x8xf32> to vector<32x1xf32>
    %73 = arith.addf %72, %68 : vector<32x1xf32>
    %74 = math.tanh %73 : vector<32x1xf32>
    %75 = vector.broadcast %74 : vector<32x1xf32> to vector<32x32xf32>
    %76 = arith.mulf %75, %56 : vector<32x32xf32>
    %cst_35 = arith.constant dense<0.000000e+00> : vector<32xf32>
    %77 = vector.multi_reduction <add>, %76, %cst_35 [0] : vector<32x32xf32> to vector<32xf32>
    %78 = vector.shape_cast %77 : vector<32xf32> to vector<1x32xf32>
    %79 = vector.broadcast %71 : vector<1x32xf32> to vector<32x32xf32>
    %80 = arith.mulf %79, %58 : vector<32x32xf32>
    %cst_36 = arith.constant dense<0.000000e+00> : vector<32xf32>
    %81 = vector.multi_reduction <add>, %80, %cst_36 [1] : vector<32x32xf32> to vector<32xf32>
    %82 = vector.shape_cast %81 : vector<32xf32> to vector<32x1xf32>
    %83 = vector.extract_strided_slice %53 {offsets = [1, 0], sizes = [1, 32], strides = [1, 1]} : vector<8x32xf32> to vector<1x32xf32>
    %84 = arith.addf %83, %78 : vector<1x32xf32>
    %85 = math.tanh %84 : vector<1x32xf32>
    %86 = vector.extract_strided_slice %54 {offsets = [0, 1], sizes = [32, 1], strides = [1, 1]} : vector<32x8xf32> to vector<32x1xf32>
    %87 = arith.addf %86, %82 : vector<32x1xf32>
    %88 = math.tanh %87 : vector<32x1xf32>
    %89 = vector.broadcast %88 : vector<32x1xf32> to vector<32x32xf32>
    %90 = arith.mulf %89, %56 : vector<32x32xf32>
    %cst_37 = arith.constant dense<0.000000e+00> : vector<32xf32>
    %91 = vector.multi_reduction <add>, %90, %cst_37 [0] : vector<32x32xf32> to vector<32xf32>
    %92 = vector.shape_cast %91 : vector<32xf32> to vector<1x32xf32>
    %93 = vector.broadcast %85 : vector<1x32xf32> to vector<32x32xf32>
    %94 = arith.mulf %93, %58 : vector<32x32xf32>
    %cst_38 = arith.constant dense<0.000000e+00> : vector<32xf32>
    %95 = vector.multi_reduction <add>, %94, %cst_38 [1] : vector<32x32xf32> to vector<32xf32>
    %96 = vector.shape_cast %95 : vector<32xf32> to vector<32x1xf32>
    %97 = vector.extract_strided_slice %53 {offsets = [2, 0], sizes = [1, 32], strides = [1, 1]} : vector<8x32xf32> to vector<1x32xf32>
    %98 = arith.addf %97, %92 : vector<1x32xf32>
    %99 = math.tanh %98 : vector<1x32xf32>
    %100 = vector.extract_strided_slice %54 {offsets = [0, 2], sizes = [32, 1], strides = [1, 1]} : vector<32x8xf32> to vector<32x1xf32>
    %101 = arith.addf %100, %96 : vector<32x1xf32>
    %102 = math.tanh %101 : vector<32x1xf32>
    %103 = vector.broadcast %102 : vector<32x1xf32> to vector<32x32xf32>
    %104 = arith.mulf %103, %56 : vector<32x32xf32>
    %cst_39 = arith.constant dense<0.000000e+00> : vector<32xf32>
    %105 = vector.multi_reduction <add>, %104, %cst_39 [0] : vector<32x32xf32> to vector<32xf32>
    %106 = vector.shape_cast %105 : vector<32xf32> to vector<1x32xf32>
    %107 = vector.broadcast %99 : vector<1x32xf32> to vector<32x32xf32>
    %108 = arith.mulf %107, %58 : vector<32x32xf32>
    %cst_40 = arith.constant dense<0.000000e+00> : vector<32xf32>
    %109 = vector.multi_reduction <add>, %108, %cst_40 [1] : vector<32x32xf32> to vector<32xf32>
    %110 = vector.shape_cast %109 : vector<32xf32> to vector<32x1xf32>
    %111 = vector.extract_strided_slice %53 {offsets = [3, 0], sizes = [1, 32], strides = [1, 1]} : vector<8x32xf32> to vector<1x32xf32>
    %112 = arith.addf %111, %106 : vector<1x32xf32>
    %113 = math.tanh %112 : vector<1x32xf32>
    %114 = vector.extract_strided_slice %54 {offsets = [0, 3], sizes = [32, 1], strides = [1, 1]} : vector<32x8xf32> to vector<32x1xf32>
    %115 = arith.addf %114, %110 : vector<32x1xf32>
    %116 = math.tanh %115 : vector<32x1xf32>
    %117 = vector.broadcast %116 : vector<32x1xf32> to vector<32x32xf32>
    %118 = arith.mulf %117, %56 : vector<32x32xf32>
    %cst_41 = arith.constant dense<0.000000e+00> : vector<32xf32>
    %119 = vector.multi_reduction <add>, %118, %cst_41 [0] : vector<32x32xf32> to vector<32xf32>
    %120 = vector.shape_cast %119 : vector<32xf32> to vector<1x32xf32>
    %121 = vector.broadcast %113 : vector<1x32xf32> to vector<32x32xf32>
    %122 = arith.mulf %121, %58 : vector<32x32xf32>
    %cst_42 = arith.constant dense<0.000000e+00> : vector<32xf32>
    %123 = vector.multi_reduction <add>, %122, %cst_42 [1] : vector<32x32xf32> to vector<32xf32>
    %124 = vector.shape_cast %123 : vector<32xf32> to vector<32x1xf32>
    %125 = vector.extract_strided_slice %53 {offsets = [4, 0], sizes = [1, 32], strides = [1, 1]} : vector<8x32xf32> to vector<1x32xf32>
    %126 = arith.addf %125, %120 : vector<1x32xf32>
    %127 = math.tanh %126 : vector<1x32xf32>
    %128 = vector.extract_strided_slice %54 {offsets = [0, 4], sizes = [32, 1], strides = [1, 1]} : vector<32x8xf32> to vector<32x1xf32>
    %129 = arith.addf %128, %124 : vector<32x1xf32>
    %130 = math.tanh %129 : vector<32x1xf32>
    %131 = vector.broadcast %130 : vector<32x1xf32> to vector<32x32xf32>
    %132 = arith.mulf %131, %56 : vector<32x32xf32>
    %cst_43 = arith.constant dense<0.000000e+00> : vector<32xf32>
    %133 = vector.multi_reduction <add>, %132, %cst_43 [0] : vector<32x32xf32> to vector<32xf32>
    %134 = vector.shape_cast %133 : vector<32xf32> to vector<1x32xf32>
    %135 = vector.broadcast %127 : vector<1x32xf32> to vector<32x32xf32>
    %136 = arith.mulf %135, %58 : vector<32x32xf32>
    %cst_44 = arith.constant dense<0.000000e+00> : vector<32xf32>
    %137 = vector.multi_reduction <add>, %136, %cst_44 [1] : vector<32x32xf32> to vector<32xf32>
    %138 = vector.shape_cast %137 : vector<32xf32> to vector<32x1xf32>
    %139 = vector.extract_strided_slice %53 {offsets = [5, 0], sizes = [1, 32], strides = [1, 1]} : vector<8x32xf32> to vector<1x32xf32>
    %140 = arith.addf %139, %134 : vector<1x32xf32>
    %141 = math.tanh %140 : vector<1x32xf32>
    %142 = vector.extract_strided_slice %54 {offsets = [0, 5], sizes = [32, 1], strides = [1, 1]} : vector<32x8xf32> to vector<32x1xf32>
    %143 = arith.addf %142, %138 : vector<32x1xf32>
    %144 = math.tanh %143 : vector<32x1xf32>
    %145 = vector.broadcast %144 : vector<32x1xf32> to vector<32x32xf32>
    %146 = arith.mulf %145, %56 : vector<32x32xf32>
    %cst_45 = arith.constant dense<0.000000e+00> : vector<32xf32>
    %147 = vector.multi_reduction <add>, %146, %cst_45 [0] : vector<32x32xf32> to vector<32xf32>
    %148 = vector.shape_cast %147 : vector<32xf32> to vector<1x32xf32>
    %149 = vector.broadcast %141 : vector<1x32xf32> to vector<32x32xf32>
    %150 = arith.mulf %149, %58 : vector<32x32xf32>
    %cst_46 = arith.constant dense<0.000000e+00> : vector<32xf32>
    %151 = vector.multi_reduction <add>, %150, %cst_46 [1] : vector<32x32xf32> to vector<32xf32>
    %152 = vector.shape_cast %151 : vector<32xf32> to vector<32x1xf32>
    %153 = vector.extract_strided_slice %53 {offsets = [6, 0], sizes = [1, 32], strides = [1, 1]} : vector<8x32xf32> to vector<1x32xf32>
    %154 = arith.addf %153, %148 : vector<1x32xf32>
    %155 = math.tanh %154 : vector<1x32xf32>
    %156 = vector.extract_strided_slice %54 {offsets = [0, 6], sizes = [32, 1], strides = [1, 1]} : vector<32x8xf32> to vector<32x1xf32>
    %157 = arith.addf %156, %152 : vector<32x1xf32>
    %158 = math.tanh %157 : vector<32x1xf32>
    %159 = vector.broadcast %158 : vector<32x1xf32> to vector<32x32xf32>
    %160 = arith.mulf %159, %56 : vector<32x32xf32>
    %cst_47 = arith.constant dense<0.000000e+00> : vector<32xf32>
    %161 = vector.multi_reduction <add>, %160, %cst_47 [0] : vector<32x32xf32> to vector<32xf32>
    %162 = vector.shape_cast %161 : vector<32xf32> to vector<1x32xf32>
    %163 = vector.extract_strided_slice %53 {offsets = [7, 0], sizes = [1, 32], strides = [1, 1]} : vector<8x32xf32> to vector<1x32xf32>
    %164 = arith.addf %163, %162 : vector<1x32xf32>
    %165 = math.tanh %164 : vector<1x32xf32>
    %166 = tpu.concatenate %71, %85, %99, %113, %127, %141, %155, %165 in 0 : vector<1x32xf32>, vector<1x32xf32>, vector<1x32xf32>, vector<1x32xf32>, vector<1x32xf32>, vector<1x32xf32>, vector<1x32xf32>, vector<1x32xf32> -> vector<8x32xf32>
    %cst_48 = arith.constant dense<0.000000e+00> : vector<8xf32>
    %167 = vector.multi_reduction <add>, %166, %cst_48 [1] : vector<8x32xf32> to vector<8xf32>
    %168 = vector.shape_cast %167 : vector<8xf32> to vector<8x1xf32>
    %cst_49 = arith.constant 3.200000e+01 : f32
    %169 = vector.broadcast %cst_49 : f32 to vector<8x1xf32>
    %170 = arith.divf %168, %169 : vector<8x1xf32>
    %171 = vector.broadcast %170 : vector<8x1xf32> to vector<8x32xf32>
    %172 = arith.subf %166, %171 : vector<8x32xf32>
    %173 = vector.broadcast %170 : vector<8x1xf32> to vector<8x32xf32>
    %174 = arith.subf %166, %173 : vector<8x32xf32>
    %175 = arith.mulf %172, %174 : vector<8x32xf32>
    %cst_50 = arith.constant dense<0.000000e+00> : vector<8xf32>
    %176 = vector.multi_reduction <add>, %175, %cst_50 [1] : vector<8x32xf32> to vector<8xf32>
    %177 = vector.shape_cast %176 : vector<8xf32> to vector<8x1xf32>
    %cst_51 = arith.constant 3.200000e+01 : f32
    %178 = vector.broadcast %cst_51 : f32 to vector<8x1xf32>
    %179 = arith.divf %177, %178 : vector<8x1xf32>
    %180 = vector.broadcast %170 : vector<8x1xf32> to vector<8x32xf32>
    %181 = arith.subf %166, %180 : vector<8x32xf32>
    %cst_52 = arith.constant 9.99999974E-6 : f32
    %182 = vector.broadcast %cst_52 : f32 to vector<8x1xf32>
    %183 = arith.addf %179, %182 : vector<8x1xf32>
    %184 = math.rsqrt %183 : vector<8x1xf32>
    %185 = vector.broadcast %184 : vector<8x1xf32> to vector<8x32xf32>
    %186 = arith.mulf %181, %185 : vector<8x32xf32>
    %c4 = arith.constant 4 : index
    %c0_53 = arith.constant 0 : index
    %c0_54 = arith.constant 0 : index
    %187 = vector.load %arg3[%c4, %c0_53, %c0_54] : memref<7x1x32xf32, #tpu.memory_space<vmem>>, vector<1x1x32xf32>
    %188 = vector.shape_cast %187 : vector<1x1x32xf32> to vector<1x32xf32>
    %189 = vector.broadcast %188 : vector<1x32xf32> to vector<8x32xf32>
    %190 = arith.mulf %186, %189 : vector<8x32xf32>
    %c5 = arith.constant 5 : index
    %c0_55 = arith.constant 0 : index
    %c0_56 = arith.constant 0 : index
    %191 = vector.load %arg3[%c5, %c0_55, %c0_56] : memref<7x1x32xf32, #tpu.memory_space<vmem>>, vector<1x1x32xf32>
    %192 = vector.shape_cast %191 : vector<1x1x32xf32> to vector<1x32xf32>
    %193 = vector.broadcast %192 : vector<1x32xf32> to vector<8x32xf32>
    %194 = arith.addf %190, %193 : vector<8x32xf32>
    %cst_57 = arith.constant 5.000000e-01 : f32
    %195 = vector.broadcast %cst_57 : f32 to vector<8x32xf32>
    %196 = arith.mulf %195, %194 : vector<8x32xf32>
    %cst_58 = arith.constant 0.707106769 : f32
    %197 = vector.broadcast %cst_58 : f32 to vector<8x32xf32>
    %198 = arith.mulf %194, %197 : vector<8x32xf32>
    %199 = math.erf %198 : vector<8x32xf32>
    %cst_59 = arith.constant 1.000000e+00 : f32
    %200 = vector.broadcast %cst_59 : f32 to vector<8x32xf32>
    %201 = arith.addf %200, %199 : vector<8x32xf32>
    %202 = arith.mulf %196, %201 : vector<8x32xf32>
    %c2_60 = arith.constant 2 : index
    %c0_61 = arith.constant 0 : index
    %c0_62 = arith.constant 0 : index
    %203 = vector.load %arg1[%c2_60, %c0_61, %c0_62] : memref<4x32x32xbf16, #tpu.memory_space<vmem>>, vector<1x32x32xbf16>
    %204 = vector.shape_cast %203 : vector<1x32x32xbf16> to vector<32x32xbf16>
    %205 = arith.truncf %202 : vector<8x32xf32> to vector<8x32xbf16>
    %cst_63 = arith.constant dense<0.000000e+00> : vector<8x32xf32>
    %206 = tpu.matmul %205, %204, %cst_63 {dimension_numbers = #tpu.dot_dimension_numbers<[1], [0], [0], [1], [0, 0, 1, 1], [], []>} : vector<8x32xbf16>, vector<32x32xbf16>, vector<8x32xf32> -> vector<8x32xf32>
    %c6 = arith.constant 6 : index
    %c0_64 = arith.constant 0 : index
    %c0_65 = arith.constant 0 : index
    %207 = vector.load %arg3[%c6, %c0_64, %c0_65] : memref<7x1x32xf32, #tpu.memory_space<vmem>>, vector<1x1x32xf32>
    %208 = vector.shape_cast %207 : vector<1x1x32xf32> to vector<1x32xf32>
    %209 = vector.broadcast %208 : vector<1x32xf32> to vector<8x32xf32>
    %210 = arith.addf %206, %209 : vector<8x32xf32>
    %211 = tpu.transpose %210, [1, 0] : vector<8x32xf32> -> vector<32x8xf32>
    %c2_66 = arith.constant 2 : index
    %c0_67 = arith.constant 0 : index
    %c0_68 = arith.constant 0 : index
    %212 = vector.load %arg2[%c2_66, %c0_67, %c0_68] : memref<4x32x32xf32, #tpu.memory_space<vmem>>, vector<1x32x32xf32>
    %213 = vector.shape_cast %212 : vector<1x32x32xf32> to vector<32x32xf32>
    %c3_69 = arith.constant 3 : index
    %c0_70 = arith.constant 0 : index
    %c0_71 = arith.constant 0 : index
    %214 = vector.load %arg2[%c3_69, %c0_70, %c0_71] : memref<4x32x32xf32, #tpu.memory_space<vmem>>, vector<1x32x32xf32>
    %215 = vector.shape_cast %214 : vector<1x32x32xf32> to vector<32x32xf32>
    %cst_72 = arith.constant 0.000000e+00 : f32
    %216 = vector.broadcast %cst_72 : f32 to vector<1x32xf32>
    %cst_73 = arith.constant 0.000000e+00 : f32
    %217 = vector.broadcast %cst_73 : f32 to vector<32x1xf32>
    %218 = vector.broadcast %217 : vector<32x1xf32> to vector<32x32xf32>
    %219 = arith.mulf %218, %213 : vector<32x32xf32>
    %cst_74 = arith.constant dense<0.000000e+00> : vector<32xf32>
    %220 = vector.multi_reduction <add>, %219, %cst_74 [0] : vector<32x32xf32> to vector<32xf32>
    %221 = vector.shape_cast %220 : vector<32xf32> to vector<1x32xf32>
    %222 = vector.broadcast %216 : vector<1x32xf32> to vector<32x32xf32>
    %223 = arith.mulf %222, %215 : vector<32x32xf32>
    %cst_75 = arith.constant dense<0.000000e+00> : vector<32xf32>
    %224 = vector.multi_reduction <add>, %223, %cst_75 [1] : vector<32x32xf32> to vector<32xf32>
    %225 = vector.shape_cast %224 : vector<32xf32> to vector<32x1xf32>
    %226 = vector.extract_strided_slice %210 {offsets = [0, 0], sizes = [1, 32], strides = [1, 1]} : vector<8x32xf32> to vector<1x32xf32>
    %227 = arith.addf %226, %221 : vector<1x32xf32>
    %228 = math.tanh %227 : vector<1x32xf32>
    %229 = vector.extract_strided_slice %211 {offsets = [0, 0], sizes = [32, 1], strides = [1, 1]} : vector<32x8xf32> to vector<32x1xf32>
    %230 = arith.addf %229, %225 : vector<32x1xf32>
    %231 = math.tanh %230 : vector<32x1xf32>
    %232 = vector.broadcast %231 : vector<32x1xf32> to vector<32x32xf32>
    %233 = arith.mulf %232, %213 : vector<32x32xf32>
    %cst_76 = arith.constant dense<0.000000e+00> : vector<32xf32>
    %234 = vector.multi_reduction <add>, %233, %cst_76 [0] : vector<32x32xf32> to vector<32xf32>
    %235 = vector.shape_cast %234 : vector<32xf32> to vector<1x32xf32>
    %236 = vector.broadcast %228 : vector<1x32xf32> to vector<32x32xf32>
    %237 = arith.mulf %236, %215 : vector<32x32xf32>
    %cst_77 = arith.constant dense<0.000000e+00> : vector<32xf32>
    %238 = vector.multi_reduction <add>, %237, %cst_77 [1] : vector<32x32xf32> to vector<32xf32>
    %239 = vector.shape_cast %238 : vector<32xf32> to vector<32x1xf32>
    %240 = vector.extract_strided_slice %210 {offsets = [1, 0], sizes = [1, 32], strides = [1, 1]} : vector<8x32xf32> to vector<1x32xf32>
    %241 = arith.addf %240, %235 : vector<1x32xf32>
    %242 = math.tanh %241 : vector<1x32xf32>
    %243 = vector.extract_strided_slice %211 {offsets = [0, 1], sizes = [32, 1], strides = [1, 1]} : vector<32x8xf32> to vector<32x1xf32>
    %244 = arith.addf %243, %239 : vector<32x1xf32>
    %245 = math.tanh %244 : vector<32x1xf32>
    %246 = vector.broadcast %245 : vector<32x1xf32> to vector<32x32xf32>
    %247 = arith.mulf %246, %213 : vector<32x32xf32>
    %cst_78 = arith.constant dense<0.000000e+00> : vector<32xf32>
    %248 = vector.multi_reduction <add>, %247, %cst_78 [0] : vector<32x32xf32> to vector<32xf32>
    %249 = vector.shape_cast %248 : vector<32xf32> to vector<1x32xf32>
    %250 = vector.broadcast %242 : vector<1x32xf32> to vector<32x32xf32>
    %251 = arith.mulf %250, %215 : vector<32x32xf32>
    %cst_79 = arith.constant dense<0.000000e+00> : vector<32xf32>
    %252 = vector.multi_reduction <add>, %251, %cst_79 [1] : vector<32x32xf32> to vector<32xf32>
    %253 = vector.shape_cast %252 : vector<32xf32> to vector<32x1xf32>
    %254 = vector.extract_strided_slice %210 {offsets = [2, 0], sizes = [1, 32], strides = [1, 1]} : vector<8x32xf32> to vector<1x32xf32>
    %255 = arith.addf %254, %249 : vector<1x32xf32>
    %256 = math.tanh %255 : vector<1x32xf32>
    %257 = vector.extract_strided_slice %211 {offsets = [0, 2], sizes = [32, 1], strides = [1, 1]} : vector<32x8xf32> to vector<32x1xf32>
    %258 = arith.addf %257, %253 : vector<32x1xf32>
    %259 = math.tanh %258 : vector<32x1xf32>
    %260 = vector.broadcast %259 : vector<32x1xf32> to vector<32x32xf32>
    %261 = arith.mulf %260, %213 : vector<32x32xf32>
    %cst_80 = arith.constant dense<0.000000e+00> : vector<32xf32>
    %262 = vector.multi_reduction <add>, %261, %cst_80 [0] : vector<32x32xf32> to vector<32xf32>
    %263 = vector.shape_cast %262 : vector<32xf32> to vector<1x32xf32>
    %264 = vector.broadcast %256 : vector<1x32xf32> to vector<32x32xf32>
    %265 = arith.mulf %264, %215 : vector<32x32xf32>
    %cst_81 = arith.constant dense<0.000000e+00> : vector<32xf32>
    %266 = vector.multi_reduction <add>, %265, %cst_81 [1] : vector<32x32xf32> to vector<32xf32>
    %267 = vector.shape_cast %266 : vector<32xf32> to vector<32x1xf32>
    %268 = vector.extract_strided_slice %210 {offsets = [3, 0], sizes = [1, 32], strides = [1, 1]} : vector<8x32xf32> to vector<1x32xf32>
    %269 = arith.addf %268, %263 : vector<1x32xf32>
    %270 = math.tanh %269 : vector<1x32xf32>
    %271 = vector.extract_strided_slice %211 {offsets = [0, 3], sizes = [32, 1], strides = [1, 1]} : vector<32x8xf32> to vector<32x1xf32>
    %272 = arith.addf %271, %267 : vector<32x1xf32>
    %273 = math.tanh %272 : vector<32x1xf32>
    %274 = vector.broadcast %273 : vector<32x1xf32> to vector<32x32xf32>
    %275 = arith.mulf %274, %213 : vector<32x32xf32>
    %cst_82 = arith.constant dense<0.000000e+00> : vector<32xf32>
    %276 = vector.multi_reduction <add>, %275, %cst_82 [0] : vector<32x32xf32> to vector<32xf32>
    %277 = vector.shape_cast %276 : vector<32xf32> to vector<1x32xf32>
    %278 = vector.broadcast %270 : vector<1x32xf32> to vector<32x32xf32>
    %279 = arith.mulf %278, %215 : vector<32x32xf32>
    %cst_83 = arith.constant dense<0.000000e+00> : vector<32xf32>
    %280 = vector.multi_reduction <add>, %279, %cst_83 [1] : vector<32x32xf32> to vector<32xf32>
    %281 = vector.shape_cast %280 : vector<32xf32> to vector<32x1xf32>
    %282 = vector.extract_strided_slice %210 {offsets = [4, 0], sizes = [1, 32], strides = [1, 1]} : vector<8x32xf32> to vector<1x32xf32>
    %283 = arith.addf %282, %277 : vector<1x32xf32>
    %284 = math.tanh %283 : vector<1x32xf32>
    %285 = vector.extract_strided_slice %211 {offsets = [0, 4], sizes = [32, 1], strides = [1, 1]} : vector<32x8xf32> to vector<32x1xf32>
    %286 = arith.addf %285, %281 : vector<32x1xf32>
    %287 = math.tanh %286 : vector<32x1xf32>
    %288 = vector.broadcast %287 : vector<32x1xf32> to vector<32x32xf32>
    %289 = arith.mulf %288, %213 : vector<32x32xf32>
    %cst_84 = arith.constant dense<0.000000e+00> : vector<32xf32>
    %290 = vector.multi_reduction <add>, %289, %cst_84 [0] : vector<32x32xf32> to vector<32xf32>
    %291 = vector.shape_cast %290 : vector<32xf32> to vector<1x32xf32>
    %292 = vector.broadcast %284 : vector<1x32xf32> to vector<32x32xf32>
    %293 = arith.mulf %292, %215 : vector<32x32xf32>
    %cst_85 = arith.constant dense<0.000000e+00> : vector<32xf32>
    %294 = vector.multi_reduction <add>, %293, %cst_85 [1] : vector<32x32xf32> to vector<32xf32>
    %295 = vector.shape_cast %294 : vector<32xf32> to vector<32x1xf32>
    %296 = vector.extract_strided_slice %210 {offsets = [5, 0], sizes = [1, 32], strides = [1, 1]} : vector<8x32xf32> to vector<1x32xf32>
    %297 = arith.addf %296, %291 : vector<1x32xf32>
    %298 = math.tanh %297 : vector<1x32xf32>
    %299 = vector.extract_strided_slice %211 {offsets = [0, 5], sizes = [32, 1], strides = [1, 1]} : vector<32x8xf32> to vector<32x1xf32>
    %300 = arith.addf %299, %295 : vector<32x1xf32>
    %301 = math.tanh %300 : vector<32x1xf32>
    %302 = vector.broadcast %301 : vector<32x1xf32> to vector<32x32xf32>
    %303 = arith.mulf %302, %213 : vector<32x32xf32>
    %cst_86 = arith.constant dense<0.000000e+00> : vector<32xf32>
    %304 = vector.multi_reduction <add>, %303, %cst_86 [0] : vector<32x32xf32> to vector<32xf32>
    %305 = vector.shape_cast %304 : vector<32xf32> to vector<1x32xf32>
    %306 = vector.broadcast %298 : vector<1x32xf32> to vector<32x32xf32>
    %307 = arith.mulf %306, %215 : vector<32x32xf32>
    %cst_87 = arith.constant dense<0.000000e+00> : vector<32xf32>
    %308 = vector.multi_reduction <add>, %307, %cst_87 [1] : vector<32x32xf32> to vector<32xf32>
    %309 = vector.shape_cast %308 : vector<32xf32> to vector<32x1xf32>
    %310 = vector.extract_strided_slice %210 {offsets = [6, 0], sizes = [1, 32], strides = [1, 1]} : vector<8x32xf32> to vector<1x32xf32>
    %311 = arith.addf %310, %305 : vector<1x32xf32>
    %312 = math.tanh %311 : vector<1x32xf32>
    %313 = vector.extract_strided_slice %211 {offsets = [0, 6], sizes = [32, 1], strides = [1, 1]} : vector<32x8xf32> to vector<32x1xf32>
    %314 = arith.addf %313, %309 : vector<32x1xf32>
    %315 = math.tanh %314 : vector<32x1xf32>
    %316 = vector.broadcast %315 : vector<32x1xf32> to vector<32x32xf32>
    %317 = arith.mulf %316, %213 : vector<32x32xf32>
    %cst_88 = arith.constant dense<0.000000e+00> : vector<32xf32>
    %318 = vector.multi_reduction <add>, %317, %cst_88 [0] : vector<32x32xf32> to vector<32xf32>
    %319 = vector.shape_cast %318 : vector<32xf32> to vector<1x32xf32>
    %320 = vector.extract_strided_slice %210 {offsets = [7, 0], sizes = [1, 32], strides = [1, 1]} : vector<8x32xf32> to vector<1x32xf32>
    %321 = arith.addf %320, %319 : vector<1x32xf32>
    %322 = math.tanh %321 : vector<1x32xf32>
    %323 = tpu.concatenate %228, %242, %256, %270, %284, %298, %312, %322 in 0 : vector<1x32xf32>, vector<1x32xf32>, vector<1x32xf32>, vector<1x32xf32>, vector<1x32xf32>, vector<1x32xf32>, vector<1x32xf32>, vector<1x32xf32> -> vector<8x32xf32>
    %c3_89 = arith.constant 3 : index
    %c0_90 = arith.constant 0 : index
    %c0_91 = arith.constant 0 : index
    %324 = vector.load %arg1[%c3_89, %c0_90, %c0_91] : memref<4x32x32xbf16, #tpu.memory_space<vmem>>, vector<1x32x32xbf16>
    %325 = vector.shape_cast %324 : vector<1x32x32xbf16> to vector<32x32xbf16>
    %326 = vector.extract_strided_slice %325 {offsets = [0, 0], sizes = [32, 16], strides = [1, 1]} : vector<32x32xbf16> to vector<32x16xbf16>
    %327 = arith.truncf %323 : vector<8x32xf32> to vector<8x32xbf16>
    %cst_92 = arith.constant dense<0.000000e+00> : vector<8x16xf32>
    %328 = tpu.matmul %327, %326, %cst_92 {dimension_numbers = #tpu.dot_dimension_numbers<[1], [0], [0], [1], [0, 0, 1, 1], [], []>} : vector<8x32xbf16>, vector<32x16xbf16>, vector<8x16xf32> -> vector<8x16xf32>
    %c0_93 = arith.constant 0 : index
    %c0_94 = arith.constant 0 : index
    %c0_95 = arith.constant 0 : index
    %329 = vector.load %arg4[%c0_93, %c0_94, %c0_95] : memref<5x1x16xf32, #tpu.memory_space<vmem>>, vector<1x1x16xf32>
    %330 = vector.shape_cast %329 : vector<1x1x16xf32> to vector<1x16xf32>
    %331 = vector.broadcast %330 : vector<1x16xf32> to vector<8x16xf32>
    %332 = arith.addf %328, %331 : vector<8x16xf32>
    %c1_96 = arith.constant 1 : index
    %c0_97 = arith.constant 0 : index
    %c0_98 = arith.constant 0 : index
    %333 = vector.load %arg4[%c1_96, %c0_97, %c0_98] : memref<5x1x16xf32, #tpu.memory_space<vmem>>, vector<1x1x16xf32>
    %334 = vector.shape_cast %333 : vector<1x1x16xf32> to vector<1x16xf32>
    %335 = vector.broadcast %334 : vector<1x16xf32> to vector<8x16xf32>
    %336 = arith.mulf %332, %335 : vector<8x16xf32>
    %c2_99 = arith.constant 2 : index
    %c0_100 = arith.constant 0 : index
    %c0_101 = arith.constant 0 : index
    %337 = vector.load %arg4[%c2_99, %c0_100, %c0_101] : memref<5x1x16xf32, #tpu.memory_space<vmem>>, vector<1x1x16xf32>
    %338 = vector.shape_cast %337 : vector<1x1x16xf32> to vector<1x16xf32>
    %339 = vector.broadcast %338 : vector<1x16xf32> to vector<8x16xf32>
    %340 = arith.addf %336, %339 : vector<8x16xf32>
    %cst_102 = arith.constant 5.000000e-01 : f32
    %341 = vector.broadcast %cst_102 : f32 to vector<8x16xf32>
    %342 = arith.mulf %341, %340 : vector<8x16xf32>
    %cst_103 = arith.constant 0.707106769 : f32
    %343 = vector.broadcast %cst_103 : f32 to vector<8x16xf32>
    %344 = arith.mulf %340, %343 : vector<8x16xf32>
    %345 = math.erf %344 : vector<8x16xf32>
    %cst_104 = arith.constant 1.000000e+00 : f32
    %346 = vector.broadcast %cst_104 : f32 to vector<8x16xf32>
    %347 = arith.addf %346, %345 : vector<8x16xf32>
    %348 = arith.mulf %342, %347 : vector<8x16xf32>
    %c3_105 = arith.constant 3 : index
    %c0_106 = arith.constant 0 : index
    %c0_107 = arith.constant 0 : index
    %349 = vector.load %arg4[%c3_105, %c0_106, %c0_107] : memref<5x1x16xf32, #tpu.memory_space<vmem>>, vector<1x1x16xf32>
    %350 = vector.shape_cast %349 : vector<1x1x16xf32> to vector<1x16xf32>
    %351 = vector.broadcast %350 : vector<1x16xf32> to vector<8x16xf32>
    %352 = arith.mulf %348, %351 : vector<8x16xf32>
    %cst_108 = arith.constant dense<0.000000e+00> : vector<8xf32>
    %353 = vector.multi_reduction <add>, %352, %cst_108 [1] : vector<8x16xf32> to vector<8xf32>
    %354 = vector.shape_cast %353 : vector<8xf32> to vector<8x1xf32>
    %c4_109 = arith.constant 4 : index
    %c0_110 = arith.constant 0 : index
    %c0_111 = arith.constant 0 : index
    %355 = vector.load %arg4[%c4_109, %c0_110, %c0_111] : memref<5x1x16xf32, #tpu.memory_space<vmem>>, vector<1x1x16xf32>
    %356 = vector.shape_cast %355 : vector<1x1x16xf32> to vector<1x16xf32>
    %357 = vector.extract_strided_slice %356 {offsets = [0, 0], sizes = [1, 1], strides = [1, 1]} : vector<1x16xf32> to vector<1x1xf32>
    %358 = vector.broadcast %357 : vector<1x1xf32> to vector<8x1xf32>
    %359 = arith.addf %354, %358 : vector<8x1xf32>
    %360 = arith.negf %359 : vector<8x1xf32>
    %361 = math.exp %360 : vector<8x1xf32>
    %cst_112 = arith.constant 1.000000e+00 : f32
    %362 = vector.broadcast %cst_112 : f32 to vector<8x1xf32>
    %363 = arith.addf %362, %361 : vector<8x1xf32>
    %364 = arith.divf %362, %363 : vector<8x1xf32>
    %c0_113 = arith.constant 0 : index
    %c0_114 = arith.constant 0 : index
    %365 = vector.load %arg5[%c0_113, %c0_114] : memref<8x1xf32, #tpu.memory_space<vmem>>, vector<8x1xf32>
    tpu.vector_store %arg5[%c0_113, %c0_114], %364 {strides = array<i32>} : memref<8x1xf32, #tpu.memory_space<vmem>>, vector<8x1xf32>,
    return
  }
}

</mosaic_0001>

<bundles_post_ra>
// kernel: tpu_custom_call.1
= control target key start
LH: loop header
LB: loop body
LE: loop exit
PB: predicated region body
PF: predicated region fallthrough
CT: control target
= control target key end

     0   :  { %10 = vsyncpa [#allocation3], 0  ;;  %s2470_s0 = inlined_call_operand.hbm [shape: f32[8,16], index: 0, kind: input, shape index: {}]   ;;  %s2471_s1 = inlined_call_operand.hbm [shape: bf16[4,32,32], index: 1, kind: input, shape index: {}]   ;;  %s2472_s2 = inlined_call_operand.hbm [shape: f32[4,32,32], index: 2, kind: input, shape index: {}]   ;;  %s2473_s3 = inlined_call_operand.hbm [shape: f32[7,1,32], index: 3, kind: input, shape index: {}]   ;;  %s2474_s4 = inlined_call_operand.hbm [shape: f32[5,1,16], index: 4, kind: input, shape index: {}]   ;;  %s2475_s5 = inlined_call_operand.vmem [shape: f32[8,1], index: 5, kind: output, shape index: {}]  }
   0x1   :  { %11 = vsyncpa [#allocation5], 0  ;;  %s28_s20 = sshll.u32 %s2471_s1, 4  ;;  %s29_s20 = int_to_ptr.hbm [resolvable:$true] %s28_s20 }
   0x2   :  { %12 = vsyncpa [#allocation8], 0  ;;  %s1939_s21 = smov [#allocation4]   ;;  %s54_s25 = sshll.u32 %s2473_s3, 4  ;;  %s55_s25 = int_to_ptr.hbm [resolvable:$true] %s54_s25 }
   0x3   :  { %s30_s22 = sshll.u32 %s1939_s21, 4  ;;  %s1940_s26 = smov 64   ;;  %s31_s22 = int_to_ptr.vmem [resolvable:$true] %s30_s22 }
   0x4   :  { %s1941_s27 = smov 4   ;;  %s1942_s28 = smov [#allocation7]  }
   0x5   :  { %36 = dma.hbm_to_vmem [thread:$0]  %s29_s20, 1024, %s31_s22, [#allocation5], %s1940_s26, %s1940_s26, %s1941_s27  }
   0x6   :  { %s56_s29 = sshll.u32 %s1942_s28, 4  ;;  %s1943_s30 = smov 16   ;;  %s57_s29 = int_to_ptr.vmem [resolvable:$true] %s56_s29 }
   0x7   :  { %s1944_s6 = smov 1   ;;  %s18_s8 = sshll.u32 %s2470_s0, 4  ;;  %s19_s8 = int_to_ptr.hbm [resolvable:$true] %s18_s8 }
   0x8   :  { %62 = dma.hbm_to_vmem [thread:$0]  %s55_s25, 112, %s57_s29, [#allocation8], %s1943_s30, %s1943_s30, %s1944_s6  }
   0x9   :  { %s1945_s9 = smov [#allocation2]   ;;  %s41_s12 = sshll.u32 %s2472_s2, 4  ;;  %s42_s12 = int_to_ptr.hbm [resolvable:$true] %s41_s12 }
   0xa   :  { %s20_s10 = sshll.u32 %s1945_s9, 4  ;;  %s1946_s13 = smov [#allocation6]   ;;  %s21_s10 = int_to_ptr.vmem [resolvable:$true] %s20_s10 }
   0xb   :  { %23 = dma.hbm_to_vmem [thread:$0]  %s19_s8, 128, %s21_s10, [#allocation3]  }
   0xc   :  { %s43_s14 = sshll.u32 %s1946_s13, 4  ;;  %s1947_s15 = smov 128   ;;  %s44_s14 = int_to_ptr.vmem [resolvable:$true] %s43_s14 }
   0xd   :  { %s1948_s16 = smov 8   ;;  %s67_s0 = sshll.u32 %s2474_s4, 4  ;;  %s68_s0 = int_to_ptr.hbm [resolvable:$true] %s67_s0 }
   0xe   :  { %49 = dma.hbm_to_vmem [thread:$0]  %s42_s12, 2048, %s44_s14, [#allocation5], %s1947_s15, %s1947_s15, %s1948_s16  }
   0xf   :  { %s1949_s19 = smov [#allocation9]  }
  0x10   :  { %s69_s20 = sshll.u32 %s1949_s19, 4  ;;  %s70_s20 = int_to_ptr.vmem [resolvable:$true] %s69_s20 }
  0x11   :  { %75 = dma.hbm_to_vmem [thread:$0]  %s68_s0, 80, %s70_s20, [#allocation8], %s1943_s30, %s1943_s30, %s1944_s6  }
  0x12   :  { %1933 = dma.done.wait [#allocation3], 128  }
  0x13   :  { %1934 = vsyncadd [#allocation3], 4294967168 }
  0x14   :  { %1935 = dma.done.wait [#allocation5], 3072  }
  0x15   :  { %1936 = vsyncadd [#allocation5], 4294964224 }
  0x16   :  { %1937 = dma.done.wait [#allocation8], 192  }
  0x17   :  { %1938 = vsyncadd [#allocation8], 4294967104  ;;  %v1579_v0 = vld [vmem:[#allocation4] sm:$0xff]  ;;  %v99_v1 = vld [vmem:[#allocation2] sm:$0xff]  ;;  %vm111_vm0 = vcmask 130048   ;;  %vm128_vm1 = vcmask 261120  }
  0x18   :  { %v100_v2 = vpack.c.bf16 %v99_v1, %v99_v1  ;;  %122 = vmatpush.bf16.msra.mxu0 %v1579_v0  ;;  %v1641_v3 = vld [vmem:[#allocation7] ss:$0 sm:$0xff]  ;;  %v1950_v8 = vmov 32.0   ;;  %v1581_v20 = vld [vmem:[#allocation4 + $0x18] sm:$0xff]  ;;  %v1580_v21 = vld [vmem:[#allocation4 + $0x10] sm:$0xff]  ;;  %vm760_vm10 = vcmask 1040384  }
  0x19   :  { %1653 = vrcp.f32 %v1950_v8  ;;  %246 = vmatpush.bf16.msra.mxu1 %v1581_v20  ;;  %v1642_v31 = vld [vmem:[#allocation7 + $0x1] ss:$0 sm:$0xff]  ;;  %v1643_v34 = vld [vmem:[#allocation7 + $0x2] ss:$0 sm:$0xff]  ;;  %v2019_v20 = vld [vmem:[#allocation6 + $0x28] sm:$0xff]  ;;  %vm762_vm11 = vcmask 1041408  }
  0x1a   :  { %vm764_vm12 = vcmask 1042432   ;;  %vm766_vm13 = vcmask 1043456   ;;  %vm768_vm14 = vcmask 1044480   ;;  %vm770_vm15 = vcmask 1045504  }
  0x1b   :  { %1547 = vmatmul.msk.bf16.vlgmr.msra.gmra.mxu0 %vm111_vm0, %v100_v2 }
  0x1d   :  { %247 = vmatpush.bf16.msra.mxu1 %v1580_v21  ;;  %v2021_v21 = vld [vmem:[#allocation6 + $0x38] sm:$0xff] }
  0x1f   :  { %v1654_v9 = vpop.eup %1653 }
  0x20   :  { %v133_v10 = vmul.f32 32.0, %v1654_v9  ;;  %vm137_vm2 = vweird.f32 %v1654_v9 }
  0x22   :  { %v134_v11 = vsub.f32 1.0, %v133_v10 }
  0x24   :  { %v135_v12 = vmul.f32 %v1654_v9, %v134_v11 }
  0x26   :  { %v136_v13 = vadd.f32 %v1654_v9, %v135_v12 }
  0x28   :  { %v2005_v14 = vsel %vm137_vm2, %v1654_v9, %v136_v13  ;;  %v2011_v13 = vld [vmem:[#allocation6 + $0x20] sm:$0xff]  ;;  %vm772_vm2 = vcmask 1046528  }
  0x98   :  { %v124_v4 = vpop.f32.mrf.mxu0 }
  0x99   :  { %v125_v5 = vadd.f32 %v1641_v3, %v124_v4 }
  0x9b   :  { %v129_v6 = vsel %vm128_vm1, %v125_v5, 0.0 }
  0x9c   :  { %130 = vadd.xlane.f32.xlu0 %v129_v6 }
  0xa0   :  { %v126_v7 = vpop.f32.mrf.mxu0 }
 0x10f   :  { %v131_v15 = vpop.xlane.xlu0 %130 }
 0x110   :  { %v139_v16 = vmul.f32 %v2005_v14, %v131_v15  ;;  %v2013_v15 = vld [vmem:[#allocation6 + $0x30] sm:$0xff] }
 0x112   :  { %v140_v17 = vsub.f32 %v125_v5, %v139_v16  ;;  %v311_v16 = vmul.f32 0.0, %v2011_v13 }
 0x114   :  { %v141_v18 = vmul.f32 %v140_v17, %v140_v17 }
 0x116   :  { %v142_v19 = vsel %vm128_vm1, %v141_v18, 0.0  ;;  %v315_v18 = vsel %vm128_vm1, %v311_v16, 0.0 }
 0x117   :  { %143 = vadd.xlane.f32.xlu0 %v142_v19  ;;  %316 = vadd.xlane.f32.xlu1 %v315_v18 }
 0x18a   :  { %v144_v22 = vpop.xlane.xlu0 %143 }
 0x18b   :  { %v145_v23 = vmul.f32 %v144_v22, %v2005_v14  ;;  %v312_v22 = vmul.f32 0.0, %v2019_v20 }
 0x18d   :  { %v146_v24 = vadd.f32 1e-05, %v145_v23  ;;  %v314_v23 = vmul.f32 0.0, %v2021_v21 }
 0x18f   :  { %1655 = vrsqrt.f32 %v146_v24  ;;  %vm153_vm4 = vweird.f32 %v146_v24 }
 0x195   :  { %v1656_v25 = vpop.eup %1655 }
 0x196   :  { %v148_v26 = vmul.f32 %v1656_v25, %v146_v24  ;;  %vm154_vm3 = vweird.f32 %v1656_v25  ;;  %v318_v24 = vsel %vm128_vm1, %v312_v22, 0.0 }
 0x197   :  { %vm155_vm5 = vmor %vm153_vm4, %vm154_vm3  ;;  %319 = vadd.xlane.f32.xlu1 %v318_v24 }
 0x198   :  { %v149_v27 = vmul.f32 %v1656_v25, %v148_v26  ;;  %v1644_v26 = vld [vmem:[#allocation7 + $0x3] ss:$0 sm:$0xff] }
 0x19a   :  { %v150_v28 = vmul.f32 0.5, %v149_v27 }
 0x19c   :  { %v151_v29 = vsub.f32 1.5, %v150_v28 }
 0x19e   :  { %v152_v30 = vmul.f32 %v1656_v25, %v151_v29 }
 0x1a0   :  { %v156_v32 = vsel %vm155_vm5, %v1656_v25, %v152_v30  ;;  %v324_v25 = vsel %vm128_vm1, %v314_v23, 0.0  ;;  %v1951_v30 = vmov 0  }
 0x1a1   :  { %v157_v33 = vmul.f32 %v156_v32, %v140_v17  ;;  %v313_v17 = vmul.f32 0.0, %v2013_v15  ;;  %1606 = vset.pattern.permute.xlu1 %v1951_v30  ;;  %1607 = vset.pattern.permute.xlu2 %v1951_v30  ;;  %v2032_v32 = vld [vmem:[#allocation6] sm:$0xff] }
 0x1a3   :  { %v163_v35 = vmul.f32 %v1642_v31, %v157_v33  ;;  %v321_v19 = vsel %vm128_vm1, %v313_v17, 0.0  ;;  %v317_v31 = vpop.xlane.xlu1 %316  ;;  %v2034_v33 = vld [vmem:[#allocation6 + $0x8] sm:$0xff] }
 0x1a4   :  { %322 = vadd.xlane.f32.xlu2 %v321_v19 }
 0x1a5   :  { %v169_v36 = vadd.f32 %v1643_v34, %v163_v35 }
 0x1a7   :  { %v171_v37 = vmul.f32 0.70710677, %v169_v36  ;;  %v170_v9 = vmul.f32 0.5, %v169_v36  ;;  %v294_v36 = vmul.f32 0.0, %v2032_v32 }
 0x1a9   :  { %v172_v38 = vmul.f32 %v171_v37, %v171_v37 }
 0x1ab   :  { %v173_v39 = vmin.f32 %v172_v38, 16.0  ;;  %v2041_v38 = vld [vmem:[#allocation6 + $0x10] sm:$0xff] }
 0x1ac   :  { %325 = vadd.xlane.f32.xlu2 %v324_v25 }
 0x1ad   :  { %v174_v40 = vmul.f32 2.1237322e-06, %v173_v39  ;;  %v185_v41 = vmul.f32 3.8918573e-05, %v173_v39 }
 0x1af   :  { %v175_v42 = vadd.f32 0.00028619796, %v174_v40  ;;  %v186_v43 = vadd.f32 0.001143296, %v185_v41  ;;  %v296_v40 = vmul.f32 0.0, %v2041_v38  ;;  %v298_v41 = vsel %vm128_vm1, %v294_v36, 0.0 }
 0x1b1   :  { %v176_v44 = vmul.f32 %v175_v42, %v173_v39  ;;  %v187_v45 = vmul.f32 %v186_v43, %v173_v39  ;;  %v2046_v43 = vld [vmem:[#allocation6 + $0x18] sm:$0xff] }
 0x1b3   :  { %v188_v46 = vadd.f32 0.014752088, %v187_v45  ;;  %v177_v47 = vadd.f32 0.0036580483, %v176_v44 }
 0x1b5   :  { %v189_v48 = vmul.f32 %v188_v46, %v173_v39  ;;  %v178_v50 = vmul.f32 %v177_v47, %v173_v39 }
 0x1b7   :  { %v190_v49 = vadd.f32 0.112945676, %v189_v48  ;;  %v179_v53 = vadd.f32 0.05243302, %v178_v50  ;;  %v297_v48 = vmul.f32 0.0, %v2046_v43 }
 0x1b9   :  { %v191_v51 = vmul.f32 %v190_v49, %v173_v39  ;;  %v180_v56 = vmul.f32 %v179_v53, %v173_v39  ;;  %v301_v49 = vsel %vm128_vm1, %v296_v40, 0.0 }
 0x1bb   :  { %v192_v52 = vadd.f32 0.4994258, %v191_v51  ;;  %v181_v57 = vadd.f32 0.18741608, %v180_v56 }
 0x1bd   :  { %v193_v54 = vmul.f32 %v192_v52, %v173_v39  ;;  %v182_v59 = vmul.f32 %v181_v57, %v173_v39  ;;  %v303_v52 = vsel %vm128_vm1, %v297_v48, 0.0 }
 0x1bf   :  { %v194_v55 = vadd.f32 1.0, %v193_v54  ;;  %v183_v63 = vadd.f32 1.1283791, %v182_v59 }
 0x1c1   :  { %1657 = vrcp.f32 %v194_v55  ;;  %v206_v62 = vand.u32 2147483648, %v194_v55  ;;  %v204_v1 = vand.u32 2147483647, %v194_v55  ;;  %vm200_vm7 = vweird.f32 %v194_v55 }
 0x1c2   :  { %v184_v4 = vmul.f32 %v183_v63, %v171_v37  ;;  %v295_v37 = vmul.f32 0.0, %v2034_v33 }
 0x1c3   :  { %v207_v3 = vor.u32 1.1754944e-38, %v206_v62  ;;  %vm205_vm9 = vcmp.eq.f32.partialorder %v204_v1, 8.507059e+37 }
 0x1c4   :  { %v299_v42 = vsel %vm128_vm1, %v295_v37, 0.0 }
 0x1c5   :  { %v300_v47 = vadd.f32 %v299_v42, %v298_v41  ;;  %v1952_v42 = vmov 1  }
 0x1c7   :  { %v1658_v58 = vpop.eup %1657  ;;  %v302_v51 = vadd.f32 %v301_v49, %v300_v47 }
 0x1c8   :  { %v196_v60 = vmul.f32 %v1658_v58, %v194_v55  ;;  %vm201_vm6 = vweird.f32 %v1658_v58 }
 0x1c9   :  { %vm202_vm8 = vmor %vm200_vm7, %vm201_vm6  ;;  %v304_v56 = vadd.f32 %v303_v52, %v302_v51 }
 0x1ca   :  { %v197_v61 = vsub.f32 1.0, %v196_v60 }
 0x1cb   :  { %v305_v57 = vrot.slane %v304_v56, 4 }
 0x1cc   :  { %v198_v0 = vmul.f32 %v1658_v58, %v197_v61 }
 0x1cd   :  { %v306_v62 = vadd.f32 %v305_v57, %v304_v56 }
 0x1ce   :  { %v199_v2 = vadd.f32 %v1658_v58, %v198_v0 }
 0x1cf   :  { %v307_v63 = vrot.slane %v306_v62, 2 }
 0x1d0   :  { %v203_v5 = vsel %vm202_vm8, %v1658_v58, %v199_v2 }
 0x1d1   :  { %v208_v6 = vsel %vm205_vm9, %v207_v3, %v203_v5  ;;  %v308_v1 = vadd.f32 %v307_v63, %v306_v62 }
 0x1d2   :  { %v209_v7 = vmul.f32 %v208_v6, %v184_v4 }
 0x1d3   :  { %v309_v2 = vrot.slane %v308_v1, 1 }
 0x1d4   :  { %v1548_v8 = vclamps-f32 %v209_v7, 1.0 }
 0x1d5   :  { %v310_v3 = vadd.f32 %v309_v2, %v308_v1 }
 0x1d6   :  { %v212_v10 = vadd.f32 1.0, %v1548_v8 }
 0x1d8   :  { %v213_v11 = vmul.f32 %v212_v10, %v170_v9 }
 0x1da   :  { %v219_v12 = vpack.c.bf16 %v213_v11, %v213_v11 }
 0x1dc   :  { %1557 = vmatmul.msk.bf16.vlgmr.msra.gmra.mxu1 %vm128_vm1, %v219_v12 }
 0x20a   :  { %v320_v39 = vpop.xlane.xlu1 %319 }
 0x217   :  { %v323_v50 = vpop.xlane.xlu2 %322 }
 0x21f   :  { %v326_v58 = vpop.xlane.xlu2 %325 }
 0x259   :  { %v249_v27 = vpop.f32.mrf.mxu1 }
 0x25a   :  { %v2027_v28 = vadd.f32 %v1644_v26, %v249_v27 }
 0x25c   :  { %253 = vxpose.xlu0.b32.start.end [1/1] (short) (narrow) %v2027_v28, 32  ;;  %v327_v4 = vadd.f32 %v310_v3, %v2027_v28 }
 0x261   :  { %v251_v29 = vpop.f32.mrf.mxu1 }
 0x300   :  { %v2036_v34 = vpop.trf.xlu0 }
 0x301   :  { %v329_v35 = vadd.f32 %v317_v31, %v2036_v34 }
 0x303   :  { %1659 = vtanh.f32 %v329_v35 }
 0x308   :  { %v2048_v44 = vpop.trf.xlu0 }
 0x309   :  { %v1660_v45 = vpop.eup %1659  ;;  %v330_v46 = vadd.f32 %v320_v39, %v2048_v44 }
 0x30a   :  { %339 = vperm.xlu1 %1606, %v1660_v45  }
 0x30b   :  { %1661 = vtanh.f32 %v330_v46 }
 0x310   :  { %v2054_v53 = vpop.trf.xlu0 }
 0x311   :  { %v1662_v54 = vpop.eup %1661  ;;  %v331_v55 = vadd.f32 %v323_v50, %v2054_v53 }
 0x312   :  { %344 = vperm.xlu2 %1607, %v1662_v54  }
 0x313   :  { %1663 = vtanh.f32 %v331_v55 }
 0x318   :  { %v2057_v59 = vpop.trf.xlu0 }
 0x319   :  { %v1664_v60 = vpop.eup %1663  ;;  %v332_v61 = vadd.f32 %v326_v58, %v2057_v59 }
 0x31a   :  { %349 = vperm.xlu2 %1607, %v1664_v60  }
 0x31b   :  { %1665 = vtanh.f32 %v332_v61 }
 0x31c   :  { %1667 = vtanh.f32 %v327_v4 }
 0x321   :  { %v1666_v0 = vpop.eup %1665 }
 0x322   :  { %354 = vperm.xlu1 %1606, %v1666_v0   ;;  %v2061_v5 = vpop.eup %1667  ;;  %1609 = vset.pattern.permute.xlu2 %v1952_v42 }
 0x323   :  { %v374_v6 = vperm.slane %v2061_v5, 0 }
 0x325   :  { %v375_v7 = vmul.f32 %v374_v6, %v2011_v13  ;;  %v376_v9 = vmul.f32 %v374_v6, %v2019_v20  ;;  %v377_v11 = vmul.f32 %v374_v6, %v2013_v15  ;;  %v378_v16 = vmul.f32 %v374_v6, %v2021_v21 }
 0x327   :  { %v379_v8 = vsel %vm128_vm1, %v375_v7, 0.0  ;;  %v382_v10 = vsel %vm128_vm1, %v376_v9, 0.0  ;;  %v385_v12 = vsel %vm128_vm1, %v377_v11, 0.0  ;;  %v388_v17 = vsel %vm128_vm1, %v378_v16, 0.0 }
 0x328   :  { %v1953_v9 = vmov 2  }
 0x32a   :  { %1608 = vset.pattern.permute.xlu1 %v1952_v42 }
 0x343   :  { %380 = vadd.xlane.f32.xlu2 %v379_v8 }
 0x34c   :  { %383 = vadd.xlane.f32.xlu1 %v382_v10 }
 0x354   :  { %386 = vadd.xlane.f32.xlu1 %v385_v12 }
 0x35c   :  { %389 = vadd.xlane.f32.xlu1 %v388_v17 }
 0x36c   :  { %v345_v18 = vpop.permute.xlu2 %344 }
 0x36d   :  { %v358_v23 = vmul.f32 %v345_v18, %v2034_v33 }
 0x36f   :  { %v362_v26 = vsel %vm128_vm1, %v358_v23, 0.0 }
 0x374   :  { %v350_v24 = vpop.permute.xlu2 %349 }
 0x375   :  { %v359_v27 = vmul.f32 %v350_v24, %v2041_v38 }
 0x377   :  { %v364_v35 = vsel %vm128_vm1, %v359_v27, 0.0 }
 0x37c   :  { %v340_v19 = vpop.permute.xlu1 %339 }
 0x37d   :  { %v357_v22 = vmul.f32 %v340_v19, %v2032_v32 }
 0x37f   :  { %v361_v25 = vsel %vm128_vm1, %v357_v22, 0.0 }
 0x380   :  { %v363_v29 = vadd.f32 %v362_v26, %v361_v25 }
 0x382   :  { %v365_v37 = vadd.f32 %v364_v35, %v363_v29 }
 0x394   :  { %v355_v31 = vpop.permute.xlu1 %354 }
 0x395   :  { %v360_v36 = vmul.f32 %v355_v31, %v2046_v43 }
 0x397   :  { %v366_v39 = vsel %vm128_vm1, %v360_v36, 0.0 }
 0x398   :  { %v367_v40 = vadd.f32 %v366_v39, %v365_v37 }
 0x39a   :  { %v368_v41 = vrot.slane %v367_v40, 4 }
 0x39c   :  { %v369_v45 = vadd.f32 %v368_v41, %v367_v40 }
 0x39e   :  { %v370_v46 = vrot.slane %v369_v45, 2 }
 0x3a0   :  { %v371_v47 = vadd.f32 %v370_v46, %v369_v45 }
 0x3a2   :  { %v372_v48 = vrot.slane %v371_v47, 1 }
 0x3a4   :  { %v373_v49 = vadd.f32 %v372_v48, %v371_v47 }
 0x3a6   :  { %v391_v50 = vadd.f32 %v373_v49, %v2027_v28 }
 0x3a8   :  { %1669 = vtanh.f32 %v391_v50 }
 0x3ae   :  { %v2083_v51 = vpop.eup %1669 }
 0x3af   :  { %v438_v52 = vperm.slane %v2083_v51, 1 }
 0x3b1   :  { %v439_v54 = vmul.f32 %v438_v52, %v2011_v13  ;;  %v440_v2 = vmul.f32 %v438_v52, %v2019_v20  ;;  %v441_v4 = vmul.f32 %v438_v52, %v2013_v15  ;;  %v442_v7 = vmul.f32 %v438_v52, %v2021_v21 }
 0x3b3   :  { %v443_v55 = vsel %vm128_vm1, %v439_v54, 0.0  ;;  %v446_v3 = vsel %vm128_vm1, %v440_v2, 0.0  ;;  %v449_v6 = vsel %vm128_vm1, %v441_v4, 0.0  ;;  %v452_v8 = vsel %vm128_vm1, %v442_v7, 0.0 }
 0x3b4   :  { %444 = vadd.xlane.f32.xlu0 %v443_v55 }
 0x3b6   :  { %v381_v56 = vpop.xlane.xlu2 %380 }
 0x3b7   :  { %v393_v57 = vadd.f32 %v381_v56, %v2036_v34  ;;  %v761_v56 = vsel %vm760_vm10, %v2061_v5, %v2083_v51 }
 0x3b9   :  { %1671 = vtanh.f32 %v393_v57 }
 0x3bf   :  { %v1672_v58 = vpop.eup %1671  ;;  %v384_v60 = vpop.xlane.xlu1 %383 }
 0x3c0   :  { %v394_v61 = vadd.f32 %v384_v60, %v2048_v44  ;;  %403 = vperm.xlu1 %1608, %v1672_v58  }
 0x3c2   :  { %1673 = vtanh.f32 %v394_v61 }
 0x3c7   :  { %v387_v62 = vpop.xlane.xlu1 %386 }
 0x3c8   :  { %v1674_v63 = vpop.eup %1673  ;;  %v395_v0 = vadd.f32 %v387_v62, %v2054_v53 }
 0x3c9   :  { %408 = vperm.xlu2 %1609, %v1674_v63  }
 0x3ca   :  { %1675 = vtanh.f32 %v395_v0 }
 0x3cf   :  { %v390_v12 = vpop.xlane.xlu1 %389 }
 0x3d0   :  { %v1676_v1 = vpop.eup %1675  ;;  %v396_v16 = vadd.f32 %v390_v12, %v2057_v59 }
 0x3d1   :  { %413 = vperm.xlu1 %1608, %v1676_v1   ;;  %1612 = vset.pattern.permute.xlu2 %v1953_v9 }
 0x3d9   :  { %1610 = vset.pattern.permute.xlu1 %v1953_v9 }
 0x3f2   :  { %447 = vadd.xlane.f32.xlu2 %v446_v3 }
 0x3fa   :  { %450 = vadd.xlane.f32.xlu2 %v449_v6 }
 0x402   :  { %453 = vadd.xlane.f32.xlu2 %v452_v8 }
 0x423   :  { %v409_v24 = vpop.permute.xlu2 %408 }
 0x424   :  { %v422_v26 = vmul.f32 %v409_v24, %v2034_v33 }
 0x426   :  { %v426_v31 = vsel %vm128_vm1, %v422_v26, 0.0 }
 0x427   :  { %v445_v10 = vpop.xlane.xlu0 %444 }
 0x428   :  { %v457_v11 = vadd.f32 %v445_v10, %v2036_v34 }
 0x42a   :  { %1677 = vtanh.f32 %v457_v11 }
 0x42b   :  { %1679 = vtanh.f32 %v396_v16 }
 0x430   :  { %v1678_v17 = vpop.eup %1677 }
 0x431   :  { %467 = vperm.xlu1 %1610, %v1678_v17   ;;  %v1680_v18 = vpop.eup %1679 }
 0x432   :  { %v404_v19 = vpop.permute.xlu1 %403 }
 0x433   :  { %v421_v25 = vmul.f32 %v404_v19, %v2032_v32 }
 0x435   :  { %v425_v29 = vsel %vm128_vm1, %v421_v25, 0.0 }
 0x436   :  { %v427_v36 = vadd.f32 %v426_v31, %v425_v29 }
 0x439   :  { %1611 = vset.pattern.permute.xlu1 %v1952_v42 }
 0x43a   :  { %418 = vperm.xlu1 %1611, %v1680_v18  }
 0x443   :  { %v414_v22 = vpop.permute.xlu1 %413 }
 0x444   :  { %v423_v27 = vmul.f32 %v414_v22, %v2041_v38 }
 0x446   :  { %v428_v35 = vsel %vm128_vm1, %v423_v27, 0.0 }
 0x447   :  { %v429_v40 = vadd.f32 %v428_v35, %v427_v36 }
 0x465   :  { %v448_v51 = vpop.xlane.xlu2 %447 }
 0x466   :  { %v458_v3 = vadd.f32 %v448_v51, %v2048_v44 }
 0x46d   :  { %v451_v4 = vpop.xlane.xlu2 %450 }
 0x46e   :  { %v459_v6 = vadd.f32 %v451_v4, %v2054_v53 }
 0x475   :  { %v454_v8 = vpop.xlane.xlu2 %453 }
 0x476   :  { %v460_v10 = vadd.f32 %v454_v8, %v2057_v59 }
 0x4a3   :  { %v468_v23 = vpop.permute.xlu1 %467 }
 0x4a4   :  { %v485_v22 = vmul.f32 %v468_v23, %v2032_v32  ;;  %v1954_v23 = vmov 3  }
 0x4a5   :  { %1614 = vset.pattern.permute.xlu1 %v1954_v23 }
 0x4a6   :  { %v489_v26 = vsel %vm128_vm1, %v485_v22, 0.0 }
 0x4ac   :  { %v419_v37 = vpop.permute.xlu1 %418 }
 0x4ad   :  { %v424_v39 = vmul.f32 %v419_v37, %v2046_v43 }
 0x4af   :  { %v430_v41 = vsel %vm128_vm1, %v424_v39, 0.0 }
 0x4b0   :  { %v431_v45 = vadd.f32 %v430_v41, %v429_v40 }
 0x4b2   :  { %v432_v46 = vrot.slane %v431_v45, 4 }
 0x4b4   :  { %v433_v47 = vadd.f32 %v432_v46, %v431_v45 }
 0x4b6   :  { %v434_v48 = vrot.slane %v433_v47, 2 }
 0x4b8   :  { %v435_v49 = vadd.f32 %v434_v48, %v433_v47 }
 0x4ba   :  { %v436_v50 = vrot.slane %v435_v49, 1 }
 0x4bc   :  { %v437_v52 = vadd.f32 %v436_v50, %v435_v49 }
 0x4be   :  { %v455_v54 = vadd.f32 %v437_v52, %v2027_v28 }
 0x4c0   :  { %1681 = vtanh.f32 %v455_v54 }
 0x4c1   :  { %1683 = vtanh.f32 %v458_v3 }
 0x4c2   :  { %1685 = vtanh.f32 %v459_v6 }
 0x4c3   :  { %1687 = vtanh.f32 %v460_v10 }
 0x4c6   :  { %v1682_v55 = vpop.eup %1681 }
 0x4c7   :  { %v502_v57 = vperm.slane %v1682_v55, 2  ;;  %v763_v58 = vsel %vm762_vm11, %v761_v56, %v1682_v55  ;;  %v1684_v7 = vpop.eup %1683 }
 0x4c8   :  { %v1686_v11 = vpop.eup %1685 }
 0x4c9   :  { %v505_v60 = vmul.f32 %v502_v57, %v2013_v15  ;;  %v504_v61 = vmul.f32 %v502_v57, %v2019_v20  ;;  %v503_v62 = vmul.f32 %v502_v57, %v2011_v13  ;;  %v506_v5 = vmul.f32 %v502_v57, %v2021_v21  ;;  %v1688_v12 = vpop.eup %1687 }
 0x4cb   :  { %v513_v63 = vsel %vm128_vm1, %v505_v60, 0.0  ;;  %v510_v0 = vsel %vm128_vm1, %v504_v61, 0.0  ;;  %v507_v1 = vsel %vm128_vm1, %v503_v62, 0.0  ;;  %v516_v2 = vsel %vm128_vm1, %v506_v5, 0.0 }
 0x4cc   :  { %514 = vadd.xlane.f32.xlu0 %v513_v63  ;;  %511 = vadd.xlane.f32.xlu2 %v510_v0 }
 0x4cd   :  { %508 = vadd.xlane.f32.xlu1 %v507_v1 }
 0x4d5   :  { %517 = vadd.xlane.f32.xlu1 %v516_v2 }
 0x4e4   :  { %472 = vperm.xlu2 %1612, %v1684_v7  }
 0x4ec   :  { %477 = vperm.xlu2 %1612, %v1686_v11   ;;  %v1955_v11 = vmov 4  }
 0x4ed   :  { %1615 = vset.pattern.permute.xlu0 %v1955_v11 }
 0x4f4   :  { %482 = vperm.xlu2 %1612, %v1688_v12  }
 0x4fc   :  { %1613 = vset.pattern.permute.xlu2 %v1954_v23 }
 0x53f   :  { %v512_v16 = vpop.xlane.xlu2 %511  ;;  %v515_v51 = vpop.xlane.xlu0 %514 }
 0x540   :  { %v509_v0 = vpop.xlane.xlu1 %508  ;;  %v522_v5 = vadd.f32 %v512_v16, %v2048_v44  ;;  %v523_v2 = vadd.f32 %v515_v51, %v2054_v53 }
 0x541   :  { %v521_v1 = vadd.f32 %v509_v0, %v2036_v34 }
 0x547   :  { %v473_v17 = vpop.permute.xlu2 %472 }
 0x548   :  { %v486_v19 = vmul.f32 %v473_v17, %v2034_v33  ;;  %v518_v6 = vpop.xlane.xlu1 %517 }
 0x549   :  { %v524_v7 = vadd.f32 %v518_v6, %v2057_v59 }
 0x54a   :  { %v490_v25 = vsel %vm128_vm1, %v486_v19, 0.0 }
 0x54b   :  { %v491_v29 = vadd.f32 %v490_v25, %v489_v26 }
 0x54f   :  { %v478_v18 = vpop.permute.xlu2 %477 }
 0x550   :  { %v487_v24 = vmul.f32 %v478_v18, %v2041_v38 }
 0x552   :  { %v492_v27 = vsel %vm128_vm1, %v487_v24, 0.0 }
 0x553   :  { %v493_v36 = vadd.f32 %v492_v27, %v491_v29 }
 0x557   :  { %v483_v31 = vpop.permute.xlu2 %482 }
 0x558   :  { %v488_v35 = vmul.f32 %v483_v31, %v2046_v43 }
 0x55a   :  { %v494_v37 = vsel %vm128_vm1, %v488_v35, 0.0 }
 0x55b   :  { %v495_v39 = vadd.f32 %v494_v37, %v493_v36 }
 0x55d   :  { %v496_v40 = vrot.slane %v495_v39, 4 }
 0x55f   :  { %v497_v41 = vadd.f32 %v496_v40, %v495_v39 }
 0x561   :  { %v498_v45 = vrot.slane %v497_v41, 2 }
 0x563   :  { %v499_v46 = vadd.f32 %v498_v45, %v497_v41 }
 0x565   :  { %v500_v47 = vrot.slane %v499_v46, 1 }
 0x567   :  { %v501_v48 = vadd.f32 %v500_v47, %v499_v46 }
 0x569   :  { %v519_v49 = vadd.f32 %v501_v48, %v2027_v28 }
 0x56b   :  { %1689 = vtanh.f32 %v519_v49 }
 0x56c   :  { %1691 = vtanh.f32 %v521_v1 }
 0x56d   :  { %1693 = vtanh.f32 %v522_v5 }
 0x56e   :  { %1695 = vtanh.f32 %v523_v2 }
 0x56f   :  { %1697 = vtanh.f32 %v524_v7 }
 0x571   :  { %v1690_v50 = vpop.eup %1689 }
 0x572   :  { %v566_v52 = vperm.slane %v1690_v50, 3  ;;  %v2138_v54 = vsel %vm764_vm12, %v763_v58, %v1690_v50  ;;  %v1692_v3 = vpop.eup %1691 }
 0x573   :  { %v1694_v4 = vpop.eup %1693 }
 0x574   :  { %v569_v55 = vmul.f32 %v566_v52, %v2013_v15  ;;  %v568_v56 = vmul.f32 %v566_v52, %v2019_v20  ;;  %v567_v57 = vmul.f32 %v566_v52, %v2011_v13  ;;  %v570_v63 = vmul.f32 %v566_v52, %v2021_v21  ;;  %v1696_v8 = vpop.eup %1695 }
 0x575   :  { %v1698_v10 = vpop.eup %1697 }
 0x576   :  { %v577_v60 = vsel %vm128_vm1, %v569_v55, 0.0  ;;  %v574_v61 = vsel %vm128_vm1, %v568_v56, 0.0  ;;  %v571_v62 = vsel %vm128_vm1, %v567_v57, 0.0  ;;  %v580_v58 = vsel %vm128_vm1, %v570_v63, 0.0 }
 0x577   :  { %578 = vadd.xlane.f32.xlu2 %v577_v60  ;;  %575 = vadd.xlane.f32.xlu1 %v574_v61 }
 0x578   :  { %572 = vadd.xlane.f32.xlu0 %v571_v62 }
 0x580   :  { %581 = vadd.xlane.f32.xlu0 %v580_v58 }
 0x58f   :  { %531 = vperm.xlu2 %1613, %v1692_v3  }
 0x590   :  { %536 = vperm.xlu1 %1614, %v1694_v4  }
 0x597   :  { %1616 = vset.pattern.permute.xlu2 %v1955_v11 }
 0x598   :  { %541 = vperm.xlu1 %1614, %v1696_v8  }
 0x5a0   :  { %546 = vperm.xlu1 %1614, %v1698_v10  }
 0x5ea   :  { %v576_v18 = vpop.xlane.xlu1 %575  ;;  %v579_v19 = vpop.xlane.xlu2 %578 }
 0x5eb   :  { %v573_v12 = vpop.xlane.xlu0 %572  ;;  %v587_v3 = vadd.f32 %v579_v19, %v2054_v53 }
 0x5ec   :  { %v585_v16 = vadd.f32 %v573_v12, %v2036_v34 }
 0x5ee   :  { %1699 = vtanh.f32 %v585_v16 }
 0x5f2   :  { %v532_v24 = vpop.permute.xlu2 %531 }
 0x5f3   :  { %v549_v27 = vmul.f32 %v532_v24, %v2032_v32  ;;  %v582_v6 = vpop.xlane.xlu0 %581 }
 0x5f4   :  { %v1700_v17 = vpop.eup %1699  ;;  %v588_v7 = vadd.f32 %v582_v6, %v2057_v59 }
 0x5f5   :  { %595 = vperm.xlu0 %1615, %v1700_v17   ;;  %v553_v35 = vsel %vm128_vm1, %v549_v27, 0.0 }
 0x602   :  { %v537_v22 = vpop.permute.xlu1 %536 }
 0x603   :  { %v550_v26 = vmul.f32 %v537_v22, %v2034_v33 }
 0x605   :  { %v554_v31 = vsel %vm128_vm1, %v550_v26, 0.0 }
 0x606   :  { %v555_v37 = vadd.f32 %v554_v31, %v553_v35 }
 0x60a   :  { %v542_v25 = vpop.permute.xlu1 %541 }
 0x60b   :  { %v551_v29 = vmul.f32 %v542_v25, %v2041_v38 }
 0x60d   :  { %v556_v36 = vsel %vm128_vm1, %v551_v29, 0.0 }
 0x60e   :  { %v557_v41 = vadd.f32 %v556_v36, %v555_v37  ;;  %v1956_v37 = vmov 5  }
 0x60f   :  { %1617 = vset.pattern.permute.xlu0 %v1956_v37  ;;  %1618 = vset.pattern.permute.xlu1 %v1956_v37 }
 0x612   :  { %v547_v39 = vpop.permute.xlu1 %546 }
 0x613   :  { %v552_v40 = vmul.f32 %v547_v39, %v2046_v43 }
 0x615   :  { %v558_v45 = vsel %vm128_vm1, %v552_v40, 0.0 }
 0x616   :  { %v559_v46 = vadd.f32 %v558_v45, %v557_v41 }
 0x618   :  { %v560_v47 = vrot.slane %v559_v46, 4 }
 0x61a   :  { %v561_v48 = vadd.f32 %v560_v47, %v559_v46 }
 0x61c   :  { %v562_v49 = vrot.slane %v561_v48, 2 }
 0x61e   :  { %v563_v50 = vadd.f32 %v562_v49, %v561_v48 }
 0x620   :  { %v564_v52 = vrot.slane %v563_v50, 1 }
 0x622   :  { %v565_v55 = vadd.f32 %v564_v52, %v563_v50 }
 0x624   :  { %v583_v56 = vadd.f32 %v565_v55, %v2027_v28 }
 0x626   :  { %1701 = vtanh.f32 %v583_v56 }
 0x62c   :  { %v1702_v57 = vpop.eup %1701 }
 0x62d   :  { %v630_v60 = vperm.slane %v1702_v57, 4  ;;  %v767_v61 = vsel %vm766_vm13, %v2138_v54, %v1702_v57  ;;  %v586_v54 = vadd.f32 %v576_v18, %v2048_v44 }
 0x62f   :  { %v633_v62 = vmul.f32 %v630_v60, %v2013_v15  ;;  %v631_v63 = vmul.f32 %v630_v60, %v2011_v13  ;;  %v632_v58 = vmul.f32 %v630_v60, %v2019_v20  ;;  %v634_v51 = vmul.f32 %v630_v60, %v2021_v21 }
 0x630   :  { %1703 = vtanh.f32 %v586_v54 }
 0x631   :  { %v641_v0 = vsel %vm128_vm1, %v633_v62, 0.0  ;;  %v635_v1 = vsel %vm128_vm1, %v631_v63, 0.0  ;;  %v638_v5 = vsel %vm128_vm1, %v632_v58, 0.0  ;;  %v644_v2 = vsel %vm128_vm1, %v634_v51, 0.0 }
 0x632   :  { %642 = vadd.xlane.f32.xlu2 %v641_v0  ;;  %636 = vadd.xlane.f32.xlu1 %v635_v1  ;;  %1705 = vtanh.f32 %v587_v3 }
 0x633   :  { %639 = vadd.xlane.f32.xlu0 %v638_v5  ;;  %1707 = vtanh.f32 %v588_v7 }
 0x636   :  { %v1704_v4 = vpop.eup %1703 }
 0x638   :  { %v1706_v8 = vpop.eup %1705 }
 0x639   :  { %v1708_v10 = vpop.eup %1707 }
 0x63a   :  { %645 = vadd.xlane.f32.xlu1 %v644_v2 }
 0x64a   :  { %600 = vperm.xlu2 %1616, %v1704_v4   ;;  %v1957_v4 = vmov 6  }
 0x652   :  { %605 = vperm.xlu2 %1616, %v1706_v8  }
 0x65a   :  { %610 = vperm.xlu2 %1616, %v1708_v10  }
 0x662   :  { %1619 = vset.pattern.permute.xlu2 %v1956_v37 }
 0x667   :  { %v596_v17 = vpop.permute.xlu0 %595 }
 0x668   :  { %v613_v24 = vmul.f32 %v596_v17, %v2032_v32 }
 0x66a   :  { %v617_v26 = vsel %vm128_vm1, %v613_v24, 0.0 }
 0x6a5   :  { %v643_v12 = vpop.xlane.xlu2 %642  ;;  %v637_v1 = vpop.xlane.xlu1 %636 }
 0x6a6   :  { %v649_v5 = vadd.f32 %v637_v1, %v2036_v34  ;;  %v651_v51 = vadd.f32 %v643_v12, %v2054_v53 }
 0x6ad   :  { %v601_v16 = vpop.permute.xlu2 %600  ;;  %v646_v6 = vpop.xlane.xlu1 %645 }
 0x6ae   :  { %v614_v18 = vmul.f32 %v601_v16, %v2034_v33 }
 0x6b0   :  { %v618_v25 = vsel %vm128_vm1, %v614_v18, 0.0 }
 0x6b1   :  { %v619_v29 = vadd.f32 %v618_v25, %v617_v26 }
 0x6b5   :  { %v606_v22 = vpop.permute.xlu2 %605 }
 0x6b6   :  { %v615_v19 = vmul.f32 %v606_v22, %v2041_v38  ;;  %v652_v22 = vadd.f32 %v646_v6, %v2057_v59 }
 0x6b8   :  { %v620_v27 = vsel %vm128_vm1, %v615_v19, 0.0 }
 0x6b9   :  { %v621_v36 = vadd.f32 %v620_v27, %v619_v29 }
 0x6bd   :  { %v611_v31 = vpop.permute.xlu2 %610 }
 0x6be   :  { %v616_v35 = vmul.f32 %v611_v31, %v2046_v43 }
 0x6c0   :  { %v622_v39 = vsel %vm128_vm1, %v616_v35, 0.0 }
 0x6c1   :  { %v623_v40 = vadd.f32 %v622_v39, %v621_v36 }
 0x6c3   :  { %v624_v41 = vrot.slane %v623_v40, 4 }
 0x6c5   :  { %v625_v45 = vadd.f32 %v624_v41, %v623_v40 }
 0x6c7   :  { %v626_v46 = vrot.slane %v625_v45, 2 }
 0x6c9   :  { %v627_v47 = vadd.f32 %v626_v46, %v625_v45 }
 0x6cb   :  { %v628_v48 = vrot.slane %v627_v47, 1 }
 0x6cd   :  { %v629_v49 = vadd.f32 %v628_v48, %v627_v47 }
 0x6cf   :  { %v647_v50 = vadd.f32 %v629_v49, %v2027_v28 }
 0x6d1   :  { %1709 = vtanh.f32 %v647_v50 }
 0x6d2   :  { %1711 = vtanh.f32 %v649_v5 }
 0x6d3   :  { %1713 = vtanh.f32 %v651_v51 }
 0x6d7   :  { %v1710_v52 = vpop.eup %1709 }
 0x6d8   :  { %v694_v55 = vperm.slane %v1710_v52, 5  ;;  %v2190_v56 = vsel %vm768_vm14, %v767_v61, %v1710_v52  ;;  %v640_v61 = vpop.xlane.xlu0 %639 }
 0x6da   :  { %v697_v57 = vmul.f32 %v694_v55, %v2013_v15  ;;  %v696_v60 = vmul.f32 %v694_v55, %v2019_v20  ;;  %v695_v62 = vmul.f32 %v694_v55, %v2011_v13  ;;  %v650_v15 = vadd.f32 %v640_v61, %v2048_v44  ;;  %v1712_v13 = vpop.eup %1711 }
 0x6db   :  { %v1714_v20 = vpop.eup %1713  ;;  %v698_v54 = vmul.f32 %v694_v55, %v2021_v21 }
 0x6dc   :  { %v705_v63 = vsel %vm128_vm1, %v697_v57, 0.0  ;;  %v702_v58 = vsel %vm128_vm1, %v696_v60, 0.0  ;;  %v699_v0 = vsel %vm128_vm1, %v695_v62, 0.0  ;;  %1715 = vtanh.f32 %v650_v15 }
 0x6dd   :  { %706 = vadd.xlane.f32.xlu0 %v705_v63  ;;  %703 = vadd.xlane.f32.xlu1 %v702_v58  ;;  %v708_v3 = vsel %vm128_vm1, %v698_v54, 0.0 }
 0x6de   :  { %700 = vadd.xlane.f32.xlu2 %v699_v0 }
 0x6e2   :  { %v1716_v2 = vpop.eup %1715 }
 0x6f1   :  { %659 = vperm.xlu0 %1617, %v1712_v13  }
 0x6f6   :  { %669 = vperm.xlu2 %1619, %v1714_v20   ;;  %664 = vperm.xlu1 %1618, %v1716_v2  }
 0x6f9   :  { %1623 = vset.pattern.permute.xlu0 %v1957_v4 }
 0x6fe   :  { %1620 = vset.pattern.permute.xlu2 %v1957_v4  ;;  %1621 = vset.pattern.permute.xlu1 %v1957_v4 }
 0x71f   :  { %709 = vadd.xlane.f32.xlu2 %v708_v3 }
 0x750   :  { %v704_v7 = vpop.xlane.xlu1 %703  ;;  %v707_v21 = vpop.xlane.xlu0 %706 }
 0x751   :  { %v714_v8 = vadd.f32 %v704_v7, %v2048_v44  ;;  %v701_v10 = vpop.xlane.xlu2 %700  ;;  %v715_v16 = vadd.f32 %v707_v21, %v2054_v53 }
 0x752   :  { %v713_v12 = vadd.f32 %v701_v10, %v2036_v34 }
 0x753   :  { %1717 = vtanh.f32 %v714_v8 }
 0x754   :  { %1719 = vtanh.f32 %v713_v12 }
 0x755   :  { %1721 = vtanh.f32 %v715_v16 }
 0x756   :  { %1723 = vtanh.f32 %v652_v22 }
 0x759   :  { %v1718_v17 = vpop.eup %1717  ;;  %v670_v34 = vpop.permute.xlu2 %669 }
 0x75a   :  { %v1720_v18 = vpop.eup %1719  ;;  %728 = vperm.xlu1 %1621, %v1718_v17   ;;  %v679_v39 = vmul.f32 %v670_v34, %v2041_v38 }
 0x75b   :  { %723 = vperm.xlu2 %1620, %v1720_v18   ;;  %v1722_v24 = vpop.eup %1721 }
 0x75c   :  { %v1724_v19 = vpop.eup %1723  ;;  %v684_v45 = vsel %vm128_vm1, %v679_v39, 0.0 }
 0x762   :  { %733 = vperm.xlu1 %1621, %v1722_v24  }
 0x763   :  { %1622 = vset.pattern.permute.xlu2 %v1956_v37  ;;  %v660_v27 = vpop.permute.xlu0 %659 }
 0x764   :  { %674 = vperm.xlu2 %1622, %v1724_v19   ;;  %v677_v35 = vmul.f32 %v660_v27, %v2032_v32 }
 0x766   :  { %v681_v40 = vsel %vm128_vm1, %v677_v35, 0.0 }
 0x768   :  { %v665_v26 = vpop.permute.xlu1 %664 }
 0x769   :  { %v678_v29 = vmul.f32 %v665_v26, %v2034_v33 }
 0x76a   :  { %1625 = vset.pattern.permute.xlu1 %v1951_v30 }
 0x76b   :  { %v682_v36 = vsel %vm128_vm1, %v678_v29, 0.0 }
 0x76c   :  { %v683_v41 = vadd.f32 %v682_v36, %v681_v40  ;;  %v1645_v40 = vld [vmem:[#allocation7 + $0x4] ss:$0 sm:$0xff] }
 0x792   :  { %v710_v44 = vpop.xlane.xlu2 %709 }
 0x793   :  { %v716_v53 = vadd.f32 %v710_v44, %v2057_v59  ;;  %v1583_v44 = vld [vmem:[#allocation4 + $0x28] sm:$0xff] }
 0x794   :  { %884 = vmatpush.bf16.msra.mxu2 %v1583_v44 }
 0x795   :  { %1725 = vtanh.f32 %v716_v53  ;;  %v1582_v53 = vld [vmem:[#allocation4 + $0x20] sm:$0xff] }
 0x798   :  { %885 = vmatpush.bf16.msra.mxu2 %v1582_v53 }
 0x79b   :  { %v1726_v25 = vpop.eup %1725 }
 0x79c   :  { %738 = vperm.xlu0 %1623, %v1726_v25  }
 0x7a4   :  { %1624 = vset.pattern.permute.xlu0 %v1951_v30  ;;  %v685_v30 = vadd.f32 %v684_v45, %v683_v41  ;;  %v1646_v45 = vld [vmem:[#allocation7 + $0x5] ss:$0 sm:$0xff] }
 0x7b5   :  { %v724_v31 = vpop.permute.xlu2 %723 }
 0x7b6   :  { %v741_v61 = vmul.f32 %v724_v31, %v2032_v32 }
 0x7b8   :  { %v745_v13 = vsel %vm128_vm1, %v741_v61, 0.0 }
 0x7be   :  { %v675_v59 = vpop.permute.xlu2 %674 }
 0x7bf   :  { %v680_v46 = vmul.f32 %v675_v59, %v2046_v43 }
 0x7c1   :  { %v686_v47 = vsel %vm128_vm1, %v680_v46, 0.0 }
 0x7c2   :  { %v687_v48 = vadd.f32 %v686_v47, %v685_v30 }
 0x7c4   :  { %v688_v49 = vrot.slane %v687_v48, 4 }
 0x7c6   :  { %v689_v50 = vadd.f32 %v688_v49, %v687_v48 }
 0x7c8   :  { %v690_v52 = vrot.slane %v689_v50, 2 }
 0x7ca   :  { %v691_v55 = vadd.f32 %v690_v52, %v689_v50 }
 0x7cc   :  { %v692_v57 = vrot.slane %v691_v55, 1  ;;  %v729_v0 = vpop.permute.xlu1 %728 }
 0x7cd   :  { %v742_v5 = vmul.f32 %v729_v0, %v2034_v33 }
 0x7ce   :  { %v693_v60 = vadd.f32 %v692_v57, %v691_v55 }
 0x7cf   :  { %v746_v15 = vsel %vm128_vm1, %v742_v5, 0.0 }
 0x7d0   :  { %v711_v62 = vadd.f32 %v693_v60, %v2027_v28  ;;  %v747_v2 = vadd.f32 %v746_v15, %v745_v13  ;;  %v2239_v15 = vld [vmem:[#allocation6 + $0x70] sm:$0xff] }
 0x7d2   :  { %1727 = vtanh.f32 %v711_v62 }
 0x7d4   :  { %v734_v1 = vpop.permute.xlu1 %733 }
 0x7d5   :  { %v743_v51 = vmul.f32 %v734_v1, %v2041_v38 }
 0x7d7   :  { %v748_v20 = vsel %vm128_vm1, %v743_v51, 0.0 }
 0x7d8   :  { %v1728_v63 = vpop.eup %1727  ;;  %v749_v6 = vadd.f32 %v748_v20, %v747_v2  ;;  %v952_v20 = vmul.f32 0.0, %v2239_v15 }
 0x7d9   :  { %v771_v58 = vsel %vm770_vm15, %v2190_v56, %v1728_v63 }
 0x80e   :  { %v739_v54 = vpop.permute.xlu0 %738 }
 0x80f   :  { %v744_v3 = vmul.f32 %v739_v54, %v2046_v43  ;;  %v960_v54 = vsel %vm128_vm1, %v952_v20, 0.0 }
 0x811   :  { %v750_v56 = vsel %vm128_vm1, %v744_v3, 0.0 }
 0x812   :  { %v751_v7 = vadd.f32 %v750_v56, %v749_v6 }
 0x814   :  { %v752_v8 = vrot.slane %v751_v7, 4 }
 0x816   :  { %v753_v33 = vadd.f32 %v752_v8, %v751_v7 }
 0x818   :  { %v754_v10 = vrot.slane %v753_v33, 2 }
 0x81a   :  { %v755_v32 = vadd.f32 %v754_v10, %v753_v33 }
 0x81c   :  { %v756_v12 = vrot.slane %v755_v32, 1 }
 0x81e   :  { %v757_v38 = vadd.f32 %v756_v12, %v755_v32 }
 0x820   :  { %v758_v21 = vadd.f32 %v757_v38, %v2027_v28 }
 0x822   :  { %1729 = vtanh.f32 %v758_v21 }
 0x828   :  { %v1730_v16 = vpop.eup %1729 }
 0x829   :  { %v773_v17 = vsel %vm772_vm2, %v771_v58, %v1730_v16 }
 0x82a   :  { %v774_v22 = vsel %vm128_vm1, %v773_v17, 0.0 }
 0x82b   :  { %775 = vadd.xlane.f32.xlu1 %v774_v22 }
 0x89e   :  { %v776_v43 = vpop.xlane.xlu1 %775 }
 0x89f   :  { %v777_v18 = vmul.f32 %v776_v43, %v2005_v14 }
 0x8a1   :  { %v778_v24 = vsub.f32 %v773_v17, %v777_v18 }
 0x8a3   :  { %v779_v19 = vmul.f32 %v778_v24, %v778_v24 }
 0x8a5   :  { %v780_v34 = vsel %vm128_vm1, %v779_v19, 0.0 }
 0x8a6   :  { %781 = vadd.xlane.f32.xlu2 %v780_v34 }
 0x8ae   :  { %961 = vadd.xlane.f32.xlu2 %v960_v54 }
 0x919   :  { %v782_v28 = vpop.xlane.xlu2 %781 }
 0x91a   :  { %v783_v25 = vmul.f32 %v782_v28, %v2005_v14  ;;  %v2244_v28 = vld [vmem:[#allocation6 + $0x40] sm:$0xff] }
 0x91c   :  { %v784_v26 = vadd.f32 1e-05, %v783_v25  ;;  %v2246_v25 = vld [vmem:[#allocation6 + $0x48] sm:$0xff] }
 0x91e   :  { %1731 = vrsqrt.f32 %v784_v26  ;;  %vm791_vm4 = vweird.f32 %v784_v26 }
 0x924   :  { %v1732_v27 = vpop.eup %1731 }
 0x925   :  { %v786_v29 = vmul.f32 %v1732_v27, %v784_v26  ;;  %vm792_vm3 = vweird.f32 %v1732_v27  ;;  %v933_v26 = vmul.f32 0.0, %v2244_v28 }
 0x926   :  { %vm793_vm5 = vmor %vm791_vm4, %vm792_vm3 }
 0x927   :  { %v787_v31 = vmul.f32 %v1732_v27, %v786_v29  ;;  %v2250_v29 = vld [vmem:[#allocation6 + $0x50] sm:$0xff] }
 0x929   :  { %v788_v35 = vmul.f32 0.5, %v787_v31  ;;  %v935_v31 = vmul.f32 0.0, %v2250_v29 }
 0x92b   :  { %v789_v36 = vsub.f32 1.5, %v788_v35  ;;  %v937_v35 = vsel %vm128_vm1, %v933_v26, 0.0 }
 0x92d   :  { %v790_v39 = vmul.f32 %v1732_v27, %v789_v36 }
 0x92f   :  { %v794_v41 = vsel %vm793_vm5, %v1732_v27, %v790_v39  ;;  %v934_v27 = vmul.f32 0.0, %v2246_v25  ;;  %v2255_v39 = vld [vmem:[#allocation6 + $0x58] sm:$0xff] }
 0x930   :  { %v795_v59 = vmul.f32 %v794_v41, %v778_v24 }
 0x931   :  { %v938_v36 = vsel %vm128_vm1, %v934_v27, 0.0 }
 0x932   :  { %v801_v46 = vmul.f32 %v1645_v40, %v795_v59  ;;  %v2257_v40 = vld [vmem:[#allocation6 + $0x68] sm:$0xff]  ;;  %v939_v59 = vadd.f32 %v938_v36, %v937_v35 }
 0x933   :  { %v951_v41 = vmul.f32 0.0, %v2257_v40 }
 0x934   :  { %v807_v30 = vadd.f32 %v1646_v45, %v801_v46  ;;  %v936_v45 = vmul.f32 0.0, %v2255_v39  ;;  %v940_v46 = vsel %vm128_vm1, %v935_v31, 0.0 }
 0x936   :  { %v809_v47 = vmul.f32 0.70710677, %v807_v30  ;;  %v808_v19 = vmul.f32 0.5, %v807_v30  ;;  %v957_v30 = vsel %vm128_vm1, %v951_v41, 0.0 }
 0x937   :  { %958 = vadd.xlane.f32.xlu1 %v957_v30 }
 0x938   :  { %v810_v48 = vmul.f32 %v809_v47, %v809_v47 }
 0x93a   :  { %v811_v14 = vmin.f32 %v810_v48, 16.0  ;;  %v942_v48 = vsel %vm128_vm1, %v936_v45, 0.0 }
 0x93c   :  { %v812_v49 = vmul.f32 2.1237322e-06, %v811_v14  ;;  %v823_v50 = vmul.f32 3.8918573e-05, %v811_v14 }
 0x93e   :  { %v813_v52 = vadd.f32 0.00028619796, %v812_v49  ;;  %v824_v55 = vadd.f32 0.001143296, %v823_v50 }
 0x940   :  { %v814_v57 = vmul.f32 %v813_v52, %v811_v14  ;;  %v825_v60 = vmul.f32 %v824_v55, %v811_v14 }
 0x942   :  { %v826_v62 = vadd.f32 0.014752088, %v825_v60  ;;  %v815_v63 = vadd.f32 0.0036580483, %v814_v57 }
 0x944   :  { %v827_v58 = vmul.f32 %v826_v62, %v811_v14  ;;  %v816_v1 = vmul.f32 %v815_v63, %v811_v14  ;;  %v2268_v63 = vld [vmem:[#allocation6 + $0x60] sm:$0xff] }
 0x946   :  { %v828_v0 = vadd.f32 0.112945676, %v827_v58  ;;  %v817_v51 = vadd.f32 0.05243302, %v816_v1  ;;  %v950_v58 = vmul.f32 0.0, %v2268_v63 }
 0x948   :  { %v829_v5 = vmul.f32 %v828_v0, %v811_v14  ;;  %v818_v3 = vmul.f32 %v817_v51, %v811_v14  ;;  %v954_v1 = vsel %vm128_vm1, %v950_v58, 0.0 }
 0x949   :  { %955 = vadd.xlane.f32.xlu0 %v954_v1 }
 0x94a   :  { %v830_v61 = vadd.f32 0.4994258, %v829_v5  ;;  %v819_v6 = vadd.f32 0.18741608, %v818_v3  ;;  %v1647_v5 = vld [vmem:[#allocation7 + $0x6] ss:$0 sm:$0xff] }
 0x94c   :  { %v831_v13 = vmul.f32 %v830_v61, %v811_v14  ;;  %v820_v7 = vmul.f32 %v819_v6, %v811_v14  ;;  %v2264_v14 = vld [vmem:[#allocation6 + $0x78] sm:$0xff] }
 0x94d   :  { %v953_v49 = vmul.f32 0.0, %v2264_v14 }
 0x94e   :  { %v832_v2 = vadd.f32 1.0, %v831_v13  ;;  %v821_v32 = vadd.f32 1.1283791, %v820_v7 }
 0x94f   :  { %v963_v52 = vsel %vm128_vm1, %v953_v49, 0.0 }
 0x950   :  { %1733 = vrcp.f32 %v832_v2  ;;  %v844_v10 = vand.u32 2147483648, %v832_v2  ;;  %v842_v38 = vand.u32 2147483647, %v832_v2  ;;  %vm838_vm7 = vweird.f32 %v832_v2  ;;  %964 = vadd.xlane.f32.xlu1 %v963_v52 }
 0x951   :  { %v822_v17 = vmul.f32 %v821_v32, %v809_v47  ;;  %v941_v47 = vadd.f32 %v940_v46, %v939_v59  ;;  %v962_v32 = vpop.xlane.xlu2 %961 }
 0x952   :  { %v845_v16 = vor.u32 1.1754944e-38, %v844_v10  ;;  %vm843_vm9 = vcmp.eq.f32.partialorder %v842_v38, 8.507059e+37 }
 0x953   :  { %v943_v50 = vadd.f32 %v942_v48, %v941_v47 }
 0x955   :  { %v944_v55 = vrot.slane %v943_v50, 4 }
 0x956   :  { %v1734_v56 = vpop.eup %1733 }
 0x957   :  { %v834_v8 = vmul.f32 %v1734_v56, %v832_v2  ;;  %vm839_vm6 = vweird.f32 %v1734_v56  ;;  %v945_v57 = vadd.f32 %v944_v55, %v943_v50 }
 0x958   :  { %vm840_vm8 = vmor %vm838_vm7, %vm839_vm6 }
 0x959   :  { %v835_v33 = vsub.f32 1.0, %v834_v8  ;;  %v946_v60 = vrot.slane %v945_v57, 2 }
 0x95b   :  { %v836_v12 = vmul.f32 %v1734_v56, %v835_v33  ;;  %v947_v62 = vadd.f32 %v946_v60, %v945_v57 }
 0x95d   :  { %v837_v21 = vadd.f32 %v1734_v56, %v836_v12  ;;  %v948_v0 = vrot.slane %v947_v62, 1 }
 0x95f   :  { %v841_v22 = vsel %vm840_vm8, %v1734_v56, %v837_v21  ;;  %v949_v61 = vadd.f32 %v948_v0, %v947_v62 }
 0x960   :  { %v846_v43 = vsel %vm843_vm9, %v845_v16, %v841_v22 }
 0x961   :  { %v847_v18 = vmul.f32 %v846_v43, %v822_v17 }
 0x963   :  { %v1558_v24 = vclamps-f32 %v847_v18, 1.0 }
 0x965   :  { %v850_v34 = vadd.f32 1.0, %v1558_v24 }
 0x967   :  { %v851_v44 = vmul.f32 %v850_v34, %v808_v19 }
 0x969   :  { %v857_v53 = vpack.c.bf16 %v851_v44, %v851_v44 }
 0x96b   :  { %1567 = vmatmul.msk.bf16.vlgmr.msra.gmra.mxu2 %vm128_vm1, %v857_v53 }
 0x9aa   :  { %v959_v16 = vpop.xlane.xlu1 %958 }
 0x9bc   :  { %v956_v12 = vpop.xlane.xlu0 %955 }
 0x9c3   :  { %v965_v34 = vpop.xlane.xlu1 %964 }
 0x9ee   :  { %v887_v51 = vpop.f32.mrf.mxu2 }
 0x9ef   :  { %v2272_v13 = vadd.f32 %v1647_v5, %v887_v51 }
 0x9f1   :  { %891 = vxpose.xlu2.b32.start.end [1/1] (short) (narrow) %v2272_v13, 32  ;;  %v966_v20 = vadd.f32 %v949_v61, %v2272_v13 }
 0x9f3   :  { %1735 = vtanh.f32 %v966_v20 }
 0x9f6   :  { %v889_v2 = vpop.f32.mrf.mxu2 }
 0x9f9   :  { %v2276_v54 = vpop.eup %1735 }
 0x9fa   :  { %v1013_v3 = vperm.slane %v2276_v54, 0 }
 0x9fc   :  { %v1016_v6 = vmul.f32 %v1013_v3, %v2239_v15  ;;  %v1017_v7 = vmul.f32 %v1013_v3, %v2264_v14  ;;  %v1014_v33 = vmul.f32 %v1013_v3, %v2268_v63  ;;  %v1015_v31 = vmul.f32 %v1013_v3, %v2257_v40 }
 0x9fe   :  { %v1024_v56 = vsel %vm128_vm1, %v1016_v6, 0.0  ;;  %v1027_v8 = vsel %vm128_vm1, %v1017_v7, 0.0  ;;  %v1018_v10 = vsel %vm128_vm1, %v1014_v33, 0.0  ;;  %v1021_v35 = vsel %vm128_vm1, %v1015_v31, 0.0 }
 0x9ff   :  { %1025 = vadd.xlane.f32.xlu1 %v1024_v56 }
 0xa07   :  { %1028 = vadd.xlane.f32.xlu1 %v1027_v8 }
 0xa53   :  { %1629 = vset.pattern.permute.xlu2 %v1954_v23 }
 0xa72   :  { %v1026_v45 = vpop.xlane.xlu1 %1025 }
 0xa7a   :  { %1019 = vadd.xlane.f32.xlu2 %v1018_v10  ;;  %v1029_v46 = vpop.xlane.xlu1 %1028 }
 0xa8a   :  { %v2286_v38 = vpop.trf.xlu2 }
 0xa8b   :  { %v968_v21 = vadd.f32 %v956_v12, %v2286_v38 }
 0xa8d   :  { %1737 = vtanh.f32 %v968_v21 }
 0xa92   :  { %v2289_v17 = vpop.trf.xlu2 }
 0xa93   :  { %v1738_v22 = vpop.eup %1737  ;;  %v969_v43 = vadd.f32 %v959_v16, %v2289_v17 }
 0xa94   :  { %978 = vperm.xlu0 %1624, %v1738_v22  }
 0xa95   :  { %1739 = vtanh.f32 %v969_v43 }
 0xa9a   :  { %v2292_v18 = vpop.trf.xlu2 }
 0xa9b   :  { %v1740_v24 = vpop.eup %1739  ;;  %v970_v19 = vadd.f32 %v962_v32, %v2292_v18 }
 0xa9c   :  { %983 = vperm.xlu1 %1625, %v1740_v24   ;;  %1627 = vset.pattern.permute.xlu0 %v1952_v42 }
 0xa9d   :  { %1741 = vtanh.f32 %v970_v19 }
 0xaa2   :  { %v2296_v44 = vpop.trf.xlu2 }
 0xaa3   :  { %v1742_v53 = vpop.eup %1741  ;;  %v971_v26 = vadd.f32 %v965_v34, %v2296_v44  ;;  %v1034_v34 = vadd.f32 %v1026_v45, %v2292_v18 }
 0xaa4   :  { %988 = vperm.xlu1 %1625, %v1742_v53   ;;  %v1035_v53 = vadd.f32 %v1029_v46, %v2296_v44 }
 0xaa5   :  { %1743 = vtanh.f32 %v971_v26 }
 0xaab   :  { %v1744_v27 = vpop.eup %1743 }
 0xaac   :  { %993 = vperm.xlu1 %1625, %v1744_v27  }
 0xab4   :  { %1626 = vset.pattern.permute.xlu1 %v1952_v42 }
 0xabe   :  { %1022 = vadd.xlane.f32.xlu0 %v1021_v35 }
 0xaed   :  { %v1020_v36 = vpop.xlane.xlu2 %1019 }
 0xaee   :  { %v1032_v41 = vadd.f32 %v1020_v36, %v2286_v38 }
 0xaf0   :  { %1745 = vtanh.f32 %v1032_v41 }
 0xaf6   :  { %v1746_v59 = vpop.eup %1745 }
 0xaf7   :  { %1042 = vperm.xlu1 %1626, %v1746_v59  }
 0xaff   :  { %1628 = vset.pattern.permute.xlu1 %v1953_v9 }
 0xb06   :  { %v979_v47 = vpop.permute.xlu0 %978 }
 0xb07   :  { %v996_v49 = vmul.f32 %v979_v47, %v2244_v28 }
 0xb09   :  { %v1000_v55 = vsel %vm128_vm1, %v996_v49, 0.0 }
 0xb0e   :  { %v984_v30 = vpop.permute.xlu1 %983 }
 0xb0f   :  { %v997_v42 = vmul.f32 %v984_v30, %v2246_v25 }
 0xb11   :  { %v1001_v52 = vsel %vm128_vm1, %v997_v42, 0.0 }
 0xb12   :  { %v1002_v60 = vadd.f32 %v1001_v52, %v1000_v55 }
 0xb16   :  { %v989_v48 = vpop.permute.xlu1 %988 }
 0xb17   :  { %v998_v50 = vmul.f32 %v989_v48, %v2250_v29 }
 0xb19   :  { %v1003_v57 = vsel %vm128_vm1, %v998_v50, 0.0 }
 0xb1a   :  { %v1004_v58 = vadd.f32 %v1003_v57, %v1002_v60 }
 0xb1e   :  { %v994_v62 = vpop.permute.xlu1 %993 }
 0xb1f   :  { %v999_v9 = vmul.f32 %v994_v62, %v2255_v39 }
 0xb21   :  { %v1005_v0 = vsel %vm128_vm1, %v999_v9, 0.0 }
 0xb22   :  { %v1006_v1 = vadd.f32 %v1005_v0, %v1004_v58 }
 0xb24   :  { %v1007_v5 = vrot.slane %v1006_v1, 4 }
 0xb26   :  { %v1008_v61 = vadd.f32 %v1007_v5, %v1006_v1 }
 0xb28   :  { %v1009_v51 = vrot.slane %v1008_v61, 2 }
 0xb2a   :  { %v1010_v20 = vadd.f32 %v1009_v51, %v1008_v61 }
 0xb2c   :  { %v1011_v2 = vrot.slane %v1010_v20, 1 }
 0xb2e   :  { %v1012_v3 = vadd.f32 %v1011_v2, %v1010_v20 }
 0xb30   :  { %v1030_v6 = vadd.f32 %v1012_v3, %v2272_v13 }
 0xb31   :  { %v1023_v56 = vpop.xlane.xlu0 %1022 }
 0xb32   :  { %1747 = vtanh.f32 %v1030_v6  ;;  %v1033_v7 = vadd.f32 %v1023_v56, %v2289_v17 }
 0xb34   :  { %1749 = vtanh.f32 %v1033_v7 }
 0xb35   :  { %1751 = vtanh.f32 %v1034_v34 }
 0xb36   :  { %1753 = vtanh.f32 %v1035_v53 }
 0xb38   :  { %v2314_v8 = vpop.eup %1747 }
 0xb39   :  { %v1077_v33 = vperm.slane %v2314_v8, 1 }
 0xb3a   :  { %v1750_v10 = vpop.eup %1749 }
 0xb3b   :  { %1047 = vperm.xlu0 %1627, %v1750_v10   ;;  %v1078_v32 = vmul.f32 %v1077_v33, %v2268_v63  ;;  %v1079_v21 = vmul.f32 %v1077_v33, %v2257_v40  ;;  %v1080_v22 = vmul.f32 %v1077_v33, %v2239_v15  ;;  %v1081_v24 = vmul.f32 %v1077_v33, %v2264_v14  ;;  %v1752_v26 = vpop.eup %1751 }
 0xb3c   :  { %v1754_v27 = vpop.eup %1753 }
 0xb3d   :  { %v1082_v12 = vsel %vm128_vm1, %v1078_v32, 0.0  ;;  %v1085_v16 = vsel %vm128_vm1, %v1079_v21, 0.0  ;;  %v1088_v43 = vsel %vm128_vm1, %v1080_v22, 0.0  ;;  %v1091_v19 = vsel %vm128_vm1, %v1081_v24, 0.0 }
 0xb3e   :  { %1083 = vadd.xlane.f32.xlu1 %v1082_v12  ;;  %v1399_v12 = vsel %vm760_vm10, %v2276_v54, %v2314_v8 }
 0xb65   :  { %1086 = vadd.xlane.f32.xlu0 %v1085_v16 }
 0xb69   :  { %v1043_v31 = vpop.permute.xlu1 %1042 }
 0xb6a   :  { %v1060_v60 = vmul.f32 %v1043_v31, %v2244_v28 }
 0xb6c   :  { %v1064_v58 = vsel %vm128_vm1, %v1060_v60, 0.0 }
 0xb6d   :  { %1089 = vadd.xlane.f32.xlu0 %v1088_v43 }
 0xb75   :  { %1092 = vadd.xlane.f32.xlu0 %v1091_v19 }
 0xb89   :  { %1052 = vperm.xlu0 %1627, %v1752_v26  }
 0xb91   :  { %1057 = vperm.xlu0 %1627, %v1754_v27  }
 0xb99   :  { %1630 = vset.pattern.permute.xlu0 %v1954_v23 }
 0xbad   :  { %v1048_v59 = vpop.permute.xlu0 %1047 }
 0xbae   :  { %v1061_v57 = vmul.f32 %v1048_v59, %v2246_v25 }
 0xbb0   :  { %v1065_v9 = vsel %vm128_vm1, %v1061_v57, 0.0 }
 0xbb1   :  { %v1084_v35 = vpop.xlane.xlu1 %1083  ;;  %v1066_v1 = vadd.f32 %v1065_v9, %v1064_v58 }
 0xbb2   :  { %v1096_v36 = vadd.f32 %v1084_v35, %v2286_v38 }
 0xbb4   :  { %1755 = vtanh.f32 %v1096_v36 }
 0xbba   :  { %v1756_v41 = vpop.eup %1755 }
 0xbbb   :  { %1106 = vperm.xlu1 %1628, %v1756_v41  }
 0xbd8   :  { %v1087_v30 = vpop.xlane.xlu0 %1086 }
 0xbd9   :  { %v1097_v45 = vadd.f32 %v1087_v30, %v2289_v17 }
 0xbdb   :  { %1757 = vtanh.f32 %v1097_v45 }
 0xbe0   :  { %v1090_v46 = vpop.xlane.xlu0 %1089 }
 0xbe1   :  { %v1758_v47 = vpop.eup %1757  ;;  %v1098_v48 = vadd.f32 %v1090_v46, %v2292_v18 }
 0xbe2   :  { %1111 = vperm.xlu1 %1628, %v1758_v47  }
 0xbe3   :  { %1759 = vtanh.f32 %v1098_v48 }
 0xbe8   :  { %v1093_v42 = vpop.xlane.xlu0 %1092 }
 0xbe9   :  { %v1760_v49 = vpop.eup %1759  ;;  %v1099_v50 = vadd.f32 %v1093_v42, %v2296_v44 }
 0xbea   :  { %1116 = vperm.xlu1 %1628, %v1760_v49  }
 0xbeb   :  { %1761 = vtanh.f32 %v1099_v50 }
 0xbf1   :  { %v1762_v52 = vpop.eup %1761 }
 0xbf2   :  { %1121 = vperm.xlu1 %1628, %v1762_v52  }
 0xbfa   :  { %1631 = vset.pattern.permute.xlu1 %v1954_v23 }
 0xbfb   :  { %v1053_v55 = vpop.permute.xlu0 %1052 }
 0xbfc   :  { %v1062_v62 = vmul.f32 %v1053_v55, %v2250_v29 }
 0xbfe   :  { %v1067_v0 = vsel %vm128_vm1, %v1062_v62, 0.0 }
 0xbff   :  { %v1068_v51 = vadd.f32 %v1067_v0, %v1066_v1 }
 0xc03   :  { %v1058_v5 = vpop.permute.xlu0 %1057 }
 0xc04   :  { %v1063_v61 = vmul.f32 %v1058_v5, %v2255_v39 }
 0xc06   :  { %v1069_v23 = vsel %vm128_vm1, %v1063_v61, 0.0 }
 0xc07   :  { %v1070_v20 = vadd.f32 %v1069_v23, %v1068_v51 }
 0xc09   :  { %v1071_v2 = vrot.slane %v1070_v20, 4 }
 0xc0b   :  { %v1072_v3 = vadd.f32 %v1071_v2, %v1070_v20 }
 0xc0d   :  { %v1073_v6 = vrot.slane %v1072_v3, 2 }
 0xc0f   :  { %v1074_v56 = vadd.f32 %v1073_v6, %v1072_v3 }
 0xc11   :  { %v1075_v7 = vrot.slane %v1074_v56, 1 }
 0xc13   :  { %v1076_v33 = vadd.f32 %v1075_v7, %v1074_v56 }
 0xc15   :  { %v1094_v10 = vadd.f32 %v1076_v33, %v2272_v13 }
 0xc17   :  { %1763 = vtanh.f32 %v1094_v10 }
 0xc1d   :  { %v1764_v32 = vpop.eup %1763 }
 0xc1e   :  { %v1141_v21 = vperm.slane %v1764_v32, 2  ;;  %v1400_v16 = vsel %vm762_vm11, %v1399_v12, %v1764_v32 }
 0xc20   :  { %v1144_v22 = vmul.f32 %v1141_v21, %v2239_v15  ;;  %v1143_v43 = vmul.f32 %v1141_v21, %v2257_v40  ;;  %v1142_v24 = vmul.f32 %v1141_v21, %v2268_v63  ;;  %v1145_v54 = vmul.f32 %v1141_v21, %v2264_v14 }
 0xc22   :  { %v1152_v19 = vsel %vm128_vm1, %v1144_v22, 0.0  ;;  %v1149_v34 = vsel %vm128_vm1, %v1143_v43, 0.0  ;;  %v1146_v53 = vsel %vm128_vm1, %v1142_v24, 0.0  ;;  %v1155_v8 = vsel %vm128_vm1, %v1145_v54, 0.0 }
 0xc23   :  { %1153 = vadd.xlane.f32.xlu2 %v1152_v19  ;;  %1150 = vadd.xlane.f32.xlu1 %v1149_v34 }
 0xc24   :  { %1147 = vadd.xlane.f32.xlu0 %v1146_v53 }
 0xc2c   :  { %1156 = vadd.xlane.f32.xlu0 %v1155_v8 }
 0xc2d   :  { %v1107_v26 = vpop.permute.xlu1 %1106 }
 0xc2e   :  { %v1124_v36 = vmul.f32 %v1107_v26, %v2244_v28 }
 0xc30   :  { %v1128_v30 = vsel %vm128_vm1, %v1124_v36, 0.0 }
 0xc54   :  { %v1112_v27 = vpop.permute.xlu1 %1111 }
 0xc55   :  { %v1125_v35 = vmul.f32 %v1112_v27, %v2246_v25 }
 0xc57   :  { %v1129_v59 = vsel %vm128_vm1, %v1125_v35, 0.0 }
 0xc58   :  { %v1130_v46 = vadd.f32 %v1129_v59, %v1128_v30 }
 0xc5c   :  { %v1117_v31 = vpop.permute.xlu1 %1116 }
 0xc5d   :  { %v1126_v41 = vmul.f32 %v1117_v31, %v2250_v29 }
 0xc5f   :  { %v1131_v45 = vsel %vm128_vm1, %v1126_v41, 0.0 }
 0xc60   :  { %v1132_v42 = vadd.f32 %v1131_v45, %v1130_v46 }
 0xc64   :  { %v1122_v47 = vpop.permute.xlu1 %1121 }
 0xc65   :  { %v1127_v48 = vmul.f32 %v1122_v47, %v2255_v39 }
 0xc67   :  { %v1133_v49 = vsel %vm128_vm1, %v1127_v48, 0.0 }
 0xc68   :  { %v1134_v50 = vadd.f32 %v1133_v49, %v1132_v42 }
 0xc6a   :  { %v1135_v52 = vrot.slane %v1134_v50, 4 }
 0xc6c   :  { %v1136_v55 = vadd.f32 %v1135_v52, %v1134_v50 }
 0xc6e   :  { %v1137_v57 = vrot.slane %v1136_v55, 2 }
 0xc70   :  { %v1138_v60 = vadd.f32 %v1137_v57, %v1136_v55 }
 0xc72   :  { %v1139_v62 = vrot.slane %v1138_v60, 1 }
 0xc74   :  { %v1140_v9 = vadd.f32 %v1139_v62, %v1138_v60 }
 0xc76   :  { %v1158_v58 = vadd.f32 %v1140_v9, %v2272_v13 }
 0xc78   :  { %1765 = vtanh.f32 %v1158_v58 }
 0xc7e   :  { %v1766_v0 = vpop.eup %1765 }
 0xc7f   :  { %v2364_v1 = vsel %vm764_vm12, %v1400_v16, %v1766_v0  ;;  %v1205_v32 = vperm.slane %v1766_v0, 3 }
 0xc81   :  { %v1206_v12 = vmul.f32 %v1205_v32, %v2268_v63  ;;  %v1207_v16 = vmul.f32 %v1205_v32, %v2257_v40  ;;  %v1209_v22 = vmul.f32 %v1205_v32, %v2264_v14  ;;  %v1208_v19 = vmul.f32 %v1205_v32, %v2239_v15 }
 0xc83   :  { %v1210_v21 = vsel %vm128_vm1, %v1206_v12, 0.0  ;;  %v1213_v43 = vsel %vm128_vm1, %v1207_v16, 0.0  ;;  %v1219_v24 = vsel %vm128_vm1, %v1209_v22, 0.0 }
 0xc96   :  { %v1154_v5 = vpop.xlane.xlu2 %1153  ;;  %v1151_v61 = vpop.xlane.xlu1 %1150 }
 0xc97   :  { %v1162_v51 = vadd.f32 %v1154_v5, %v2292_v18  ;;  %v1161_v23 = vadd.f32 %v1151_v61, %v2289_v17  ;;  %v1148_v20 = vpop.xlane.xlu0 %1147 }
 0xc98   :  { %v1160_v2 = vadd.f32 %v1148_v20, %v2286_v38 }
 0xc99   :  { %1767 = vtanh.f32 %v1162_v51 }
 0xc9a   :  { %1769 = vtanh.f32 %v1161_v23 }
 0xc9b   :  { %1771 = vtanh.f32 %v1160_v2 }
 0xc9f   :  { %v1768_v3 = vpop.eup %1767  ;;  %v1157_v6 = vpop.xlane.xlu0 %1156 }
 0xca0   :  { %v1770_v56 = vpop.eup %1769  ;;  %v1163_v7 = vadd.f32 %v1157_v6, %v2296_v44  ;;  %1180 = vperm.xlu1 %1631, %v1768_v3  }
 0xca1   :  { %v1772_v33 = vpop.eup %1771  ;;  %1175 = vperm.xlu0 %1630, %v1770_v56  }
 0xca2   :  { %1773 = vtanh.f32 %v1163_v7  ;;  %1170 = vperm.xlu2 %1629, %v1772_v33  }
 0xca8   :  { %v1774_v10 = vpop.eup %1773 }
 0xca9   :  { %1185 = vperm.xlu1 %1631, %v1774_v10   ;;  %1635 = vset.pattern.permute.xlu0 %v1956_v37 }
 0xcaa   :  { %1633 = vset.pattern.permute.xlu2 %v1955_v11 }
 0xcb1   :  { %1632 = vset.pattern.permute.xlu1 %v1955_v11  ;;  %v1216_v11 = vsel %vm128_vm1, %v1208_v19, 0.0 }
 0xccb   :  { %1211 = vadd.xlane.f32.xlu2 %v1210_v21 }
 0xcd3   :  { %1214 = vadd.xlane.f32.xlu2 %v1213_v43  ;;  %1220 = vadd.xlane.f32.xlu1 %v1219_v24 }
 0xcdb   :  { %1217 = vadd.xlane.f32.xlu2 %v1216_v11 }
 0xcfc   :  { %v1171_v34 = vpop.permute.xlu2 %1170 }
 0xcfd   :  { %v1188_v8 = vmul.f32 %v1171_v34, %v2244_v28 }
 0xcff   :  { %v1192_v31 = vsel %vm128_vm1, %v1188_v8, 0.0 }
 0xd12   :  { %v1181_v53 = vpop.permute.xlu1 %1180 }
 0xd13   :  { %v1176_v54 = vpop.permute.xlu0 %1175  ;;  %v1190_v35 = vmul.f32 %v1181_v53, %v2250_v29 }
 0xd14   :  { %v1189_v26 = vmul.f32 %v1176_v54, %v2246_v25 }
 0xd15   :  { %v1195_v59 = vsel %vm128_vm1, %v1190_v35, 0.0 }
 0xd16   :  { %v1193_v27 = vsel %vm128_vm1, %v1189_v26, 0.0 }
 0xd17   :  { %v1194_v36 = vadd.f32 %v1193_v27, %v1192_v31 }
 0xd19   :  { %v1196_v45 = vadd.f32 %v1195_v59, %v1194_v36 }
 0xd1b   :  { %v1186_v41 = vpop.permute.xlu1 %1185 }
 0xd1c   :  { %v1191_v30 = vmul.f32 %v1186_v41, %v2255_v39 }
 0xd1e   :  { %v1197_v46 = vsel %vm128_vm1, %v1191_v30, 0.0 }
 0xd1f   :  { %v1198_v47 = vadd.f32 %v1197_v46, %v1196_v45 }
 0xd21   :  { %v1199_v48 = vrot.slane %v1198_v47, 4 }
 0xd23   :  { %v1200_v42 = vadd.f32 %v1199_v48, %v1198_v47 }
 0xd25   :  { %v1201_v49 = vrot.slane %v1200_v42, 2 }
 0xd27   :  { %v1202_v50 = vadd.f32 %v1201_v49, %v1200_v42 }
 0xd29   :  { %v1203_v52 = vrot.slane %v1202_v50, 1 }
 0xd2b   :  { %v1204_v55 = vadd.f32 %v1203_v52, %v1202_v50 }
 0xd2d   :  { %v1222_v57 = vadd.f32 %v1204_v55, %v2272_v13 }
 0xd2f   :  { %1775 = vtanh.f32 %v1222_v57 }
 0xd35   :  { %v1776_v60 = vpop.eup %1775 }
 0xd36   :  { %v2390_v62 = vperm.slane %v1776_v60, 4  ;;  %v1402_v9 = vsel %vm766_vm13, %v2364_v1, %v1776_v60 }
 0xd38   :  { %v1271_v58 = vmul.f32 %v2390_v62, %v2257_v40  ;;  %v1270_v0 = vmul.f32 %v2390_v62, %v2268_v63  ;;  %v1272_v12 = vmul.f32 %v2390_v62, %v2239_v15 }
 0xd3a   :  { %v1277_v5 = vsel %vm128_vm1, %v1271_v58, 0.0  ;;  %v1274_v61 = vsel %vm128_vm1, %v1270_v0, 0.0  ;;  %v1280_v21 = vsel %vm128_vm1, %v1272_v12, 0.0  ;;  %v1273_v0 = vmul.f32 %v2390_v62, %v2264_v14 }
 0xd3b   :  { %1278 = vadd.xlane.f32.xlu1 %v1277_v5  ;;  %1275 = vadd.xlane.f32.xlu0 %v1274_v61 }
 0xd3c   :  { %v1283_v61 = vsel %vm128_vm1, %v1273_v0, 0.0 }
 0xd3e   :  { %v1212_v51 = vpop.xlane.xlu2 %1211 }
 0xd3f   :  { %v1224_v2 = vadd.f32 %v1212_v51, %v2286_v38 }
 0xd46   :  { %v1215_v23 = vpop.xlane.xlu2 %1214  ;;  %v1221_v56 = vpop.xlane.xlu1 %1220 }
 0xd47   :  { %v1225_v20 = vadd.f32 %v1215_v23, %v2289_v17  ;;  %v1227_v33 = vadd.f32 %v1221_v56, %v2296_v44 }
 0xd49   :  { %1777 = vtanh.f32 %v1225_v20 }
 0xd4a   :  { %1779 = vtanh.f32 %v1224_v2 }
 0xd4e   :  { %v1218_v1 = vpop.xlane.xlu2 %1217 }
 0xd4f   :  { %v1778_v3 = vpop.eup %1777  ;;  %v1226_v6 = vadd.f32 %v1218_v1, %v2292_v18 }
 0xd50   :  { %1239 = vperm.xlu2 %1633, %v1778_v3   ;;  %v1780_v7 = vpop.eup %1779 }
 0xd51   :  { %1781 = vtanh.f32 %v1226_v6 }
 0xd52   :  { %1783 = vtanh.f32 %v1227_v33 }
 0xd54   :  { %1234 = vperm.xlu1 %1632, %v1780_v7  }
 0xd57   :  { %v1782_v10 = vpop.eup %1781 }
 0xd58   :  { %1244 = vperm.xlu2 %1633, %v1782_v10   ;;  %v1784_v32 = vpop.eup %1783 }
 0xd5c   :  { %1636 = vset.pattern.permute.xlu1 %v1956_v37 }
 0xd60   :  { %1249 = vperm.xlu2 %1633, %v1784_v32  }
 0xd68   :  { %1634 = vset.pattern.permute.xlu2 %v1956_v37 }
 0xd7e   :  { %1281 = vadd.xlane.f32.xlu1 %v1280_v21 }
 0xdaa   :  { %v1240_v16 = vpop.permute.xlu2 %1239 }
 0xdab   :  { %v1253_v24 = vmul.f32 %v1240_v16, %v2246_v25 }
 0xdad   :  { %v1257_v54 = vsel %vm128_vm1, %v1253_v24, 0.0 }
 0xdae   :  { %v1279_v43 = vpop.xlane.xlu1 %1278 }
 0xdaf   :  { %v1289_v23 = vadd.f32 %v1279_v43, %v2289_v17 }
 0xdb2   :  { %v1245_v22 = vpop.permute.xlu2 %1244 }
 0xdb3   :  { %v1254_v34 = vmul.f32 %v1245_v22, %v2250_v29 }
 0xdb5   :  { %v1259_v31 = vsel %vm128_vm1, %v1254_v34, 0.0 }
 0xdba   :  { %v1250_v19 = vpop.permute.xlu2 %1249 }
 0xdbb   :  { %v1255_v8 = vmul.f32 %v1250_v19, %v2255_v39 }
 0xdbd   :  { %v1261_v36 = vsel %vm128_vm1, %v1255_v8, 0.0 }
 0xdc6   :  { %v1235_v11 = vpop.permute.xlu1 %1234 }
 0xdc7   :  { %v1252_v53 = vmul.f32 %v1235_v11, %v2244_v28 }
 0xdc9   :  { %v1256_v26 = vsel %vm128_vm1, %v1252_v53, 0.0 }
 0xdca   :  { %v1258_v27 = vadd.f32 %v1257_v54, %v1256_v26 }
 0xdcc   :  { %v1260_v35 = vadd.f32 %v1259_v31, %v1258_v27 }
 0xdce   :  { %v1262_v41 = vadd.f32 %v1261_v36, %v1260_v35 }
 0xdd0   :  { %v1263_v59 = vrot.slane %v1262_v41, 4 }
 0xdd2   :  { %v1264_v30 = vadd.f32 %v1263_v59, %v1262_v41 }
 0xdd4   :  { %v1265_v45 = vrot.slane %v1264_v30, 2 }
 0xdd6   :  { %v1266_v46 = vadd.f32 %v1265_v45, %v1264_v30 }
 0xdd8   :  { %v1267_v47 = vrot.slane %v1266_v46, 1 }
 0xdda   :  { %v1268_v48 = vadd.f32 %v1267_v47, %v1266_v46 }
 0xddc   :  { %v1286_v42 = vadd.f32 %v1268_v48, %v2272_v13 }
 0xdde   :  { %1785 = vtanh.f32 %v1286_v42 }
 0xde4   :  { %v1786_v49 = vpop.eup %1785 }
 0xde5   :  { %v1333_v50 = vperm.slane %v1786_v49, 5  ;;  %v2419_v52 = vsel %vm768_vm14, %v1402_v9, %v1786_v49  ;;  %v1276_v9 = vpop.xlane.xlu0 %1275 }
 0xde7   :  { %v1334_v55 = vmul.f32 %v1333_v50, %v2268_v63  ;;  %v1335_v57 = vmul.f32 %v1333_v50, %v2257_v40  ;;  %v1288_v63 = vadd.f32 %v1276_v9, %v2286_v38  ;;  %v1337_v2 = vmul.f32 %v1333_v50, %v2264_v14 }
 0xde8   :  { %v1336_v3 = vmul.f32 %v1333_v50, %v2239_v15 }
 0xde9   :  { %v1338_v60 = vsel %vm128_vm1, %v1334_v55, 0.0  ;;  %v1341_v58 = vsel %vm128_vm1, %v1335_v57, 0.0  ;;  %v1347_v1 = vsel %vm128_vm1, %v1337_v2, 0.0  ;;  %v1585_v57 = vld [vmem:[#allocation4 + $0x38] sm:$0xff] }
 0xdea   :  { %1339 = vadd.xlane.f32.xlu2 %v1338_v60  ;;  %1342 = vadd.xlane.f32.xlu0 %v1341_v58  ;;  %v1344_v6 = vsel %vm128_vm1, %v1336_v3, 0.0  ;;  %v1584_v60 = vld [vmem:[#allocation4 + $0x30] sm:$0xff] }
 0xdeb   :  { %1437 = vmatpush.bf16.msra.mxu3 %v1585_v57 }
 0xdef   :  { %1438 = vmatpush.bf16.msra.mxu3 %v1584_v60 }
 0xdf1   :  { %v1282_v5 = vpop.xlane.xlu1 %1281 }
 0xdf2   :  { %v1290_v51 = vadd.f32 %v1282_v5, %v2292_v18  ;;  %1284 = vadd.xlane.f32.xlu0 %v1283_v61 }
 0xdf4   :  { %1787 = vtanh.f32 %v1290_v51 }
 0xdf5   :  { %1789 = vtanh.f32 %v1288_v63 }
 0xdf6   :  { %1791 = vtanh.f32 %v1289_v23 }
 0xdfa   :  { %v1788_v40 = vpop.eup %1787 }
 0xdfb   :  { %1308 = vperm.xlu1 %1636, %v1788_v40   ;;  %v1790_v20 = vpop.eup %1789 }
 0xdfc   :  { %v1792_v62 = vpop.eup %1791 }
 0xe02   :  { %1298 = vperm.xlu2 %1634, %v1790_v20  }
 0xe03   :  { %1637 = vset.pattern.permute.xlu1 %v1957_v4 }
 0xe06   :  { %1303 = vperm.xlu0 %1635, %v1792_v62  }
 0xe0a   :  { %1638 = vset.pattern.permute.xlu2 %v1957_v4 }
 0xe0e   :  { %1640 = vset.pattern.permute.xlu0 %v1957_v4 }
 0xe25   :  { %1348 = vadd.xlane.f32.xlu1 %v1347_v1 }
 0xe2b   :  { %1345 = vadd.xlane.f32.xlu2 %v1344_v6 }
 0xe5d   :  { %v1340_v56 = vpop.xlane.xlu2 %1339  ;;  %v1343_v7 = vpop.xlane.xlu0 %1342 }
 0xe5e   :  { %v1352_v33 = vadd.f32 %v1340_v56, %v2286_v38  ;;  %v1353_v10 = vadd.f32 %v1343_v7, %v2289_v17 }
 0xe60   :  { %1793 = vtanh.f32 %v1352_v33 }
 0xe61   :  { %1795 = vtanh.f32 %v1353_v10 }
 0xe65   :  { %v1285_v32 = vpop.xlane.xlu0 %1284  ;;  %v1299_v21 = vpop.permute.xlu2 %1298 }
 0xe66   :  { %v1794_v4 = vpop.eup %1793  ;;  %v1291_v14 = vadd.f32 %v1285_v32, %v2296_v44  ;;  %v1316_v38 = vmul.f32 %v1299_v21, %v2244_v28  ;;  %v1649_v32 = vld [vmem:[#allocation9 + $0x1] ss:$0 sm:$0xff] }
 0xe67   :  { %v1796_v12 = vpop.eup %1795  ;;  %1362 = vperm.xlu1 %1637, %v1794_v4  }
 0xe68   :  { %1797 = vtanh.f32 %v1291_v14  ;;  %1367 = vperm.xlu2 %1638, %v1796_v12   ;;  %v1320_v24 = vsel %vm128_vm1, %v1316_v38, 0.0  ;;  %v1650_v12 = vld [vmem:[#allocation9 + $0x2] ss:$0 sm:$0xff] }
 0xe6d   :  { %v1309_v16 = vpop.permute.xlu1 %1308 }
 0xe6e   :  { %v1798_v15 = vpop.eup %1797  ;;  %v1318_v17 = vmul.f32 %v1309_v16, %v2250_v29 }
 0xe6f   :  { %1639 = vset.pattern.permute.xlu1 %v1956_v37 }
 0xe70   :  { %1313 = vperm.xlu1 %1639, %v1798_v15   ;;  %v1323_v34 = vsel %vm128_vm1, %v1318_v17, 0.0 }
 0xe78   :  { %v1304_v22 = vpop.permute.xlu0 %1303 }
 0xe79   :  { %v1317_v43 = vmul.f32 %v1304_v22, %v2246_v25 }
 0xe7b   :  { %v1321_v19 = vsel %vm128_vm1, %v1317_v43, 0.0 }
 0xe7c   :  { %v1322_v11 = vadd.f32 %v1321_v19, %v1320_v24 }
 0xe7e   :  { %v1324_v53 = vadd.f32 %v1323_v34, %v1322_v11 }
 0xe98   :  { %v1349_v8 = vpop.xlane.xlu1 %1348 }
 0xe99   :  { %v1355_v26 = vadd.f32 %v1349_v8, %v2296_v44 }
 0xe9e   :  { %v1346_v54 = vpop.xlane.xlu2 %1345 }
 0xe9f   :  { %v1354_v37 = vadd.f32 %v1346_v54, %v2292_v18 }
 0xea1   :  { %1799 = vtanh.f32 %v1354_v37 }
 0xea2   :  { %1801 = vtanh.f32 %v1355_v26 }
 0xea7   :  { %v1800_v27 = vpop.eup %1799 }
 0xea8   :  { %1372 = vperm.xlu2 %1638, %v1800_v27   ;;  %v1802_v31 = vpop.eup %1801 }
 0xeb0   :  { %1377 = vperm.xlu2 %1638, %v1802_v31  }
 0xec2   :  { %v1368_v49 = vpop.permute.xlu2 %1367 }
 0xec3   :  { %v1381_v5 = vmul.f32 %v1368_v49, %v2246_v25 }
 0xec5   :  { %v1385_v9 = vsel %vm128_vm1, %v1381_v5, 0.0 }
 0xed9   :  { %v1363_v35 = vpop.permute.xlu1 %1362 }
 0xeda   :  { %v1380_v0 = vmul.f32 %v1363_v35, %v2244_v28 }
 0xedc   :  { %v1384_v51 = vsel %vm128_vm1, %v1380_v0, 0.0 }
 0xedd   :  { %v1386_v40 = vadd.f32 %v1385_v9, %v1384_v51  ;;  %v1651_v9 = vld [vmem:[#allocation9 + $0x3] ss:$0 sm:$0xff] }
 0xee2   :  { %v1314_v36 = vpop.permute.xlu1 %1313 }
 0xee3   :  { %v1319_v41 = vmul.f32 %v1314_v36, %v2255_v39 }
 0xee5   :  { %v1325_v59 = vsel %vm128_vm1, %v1319_v41, 0.0 }
 0xee6   :  { %v1326_v30 = vadd.f32 %v1325_v59, %v1324_v53 }
 0xee8   :  { %v1327_v45 = vrot.slane %v1326_v30, 4 }
 0xeea   :  { %v1328_v46 = vadd.f32 %v1327_v45, %v1326_v30 }
 0xeec   :  { %v1329_v47 = vrot.slane %v1328_v46, 2 }
 0xeee   :  { %v1330_v18 = vadd.f32 %v1329_v47, %v1328_v46 }
 0xef0   :  { %v1331_v48 = vrot.slane %v1330_v18, 1 }
 0xef2   :  { %v1332_v42 = vadd.f32 %v1331_v48, %v1330_v18 }
 0xef4   :  { %v1350_v44 = vadd.f32 %v1332_v42, %v2272_v13 }
 0xef6   :  { %1803 = vtanh.f32 %v1350_v44 }
 0xefc   :  { %v1804_v50 = vpop.eup %1803 }
 0xefd   :  { %v1404_v55 = vsel %vm770_vm15, %v2419_v52, %v1804_v50  ;;  %vm1534_vm15 = vcmask 7168  }
 0xf02   :  { %v1373_v58 = vpop.permute.xlu2 %1372 }
 0xf03   :  { %v1382_v61 = vmul.f32 %v1373_v58, %v2250_v29 }
 0xf05   :  { %v1387_v63 = vsel %vm128_vm1, %v1382_v61, 0.0 }
 0xf06   :  { %v1388_v20 = vadd.f32 %v1387_v63, %v1386_v40 }
 0xf0a   :  { %v1378_v23 = vpop.permute.xlu2 %1377 }
 0xf0b   :  { %v1383_v52 = vmul.f32 %v1378_v23, %v2255_v39  ;;  %v1648_v39 = vld [vmem:[#allocation9] ss:$0 sm:$0xff] }
 0xf0d   :  { %v1389_v62 = vsel %vm128_vm1, %v1383_v52, 0.0  ;;  %v1652_v52 = vld [vmem:[#allocation9 + $0x4] ss:$0 sm:$0xff] }
 0xf0e   :  { %v1390_v2 = vadd.f32 %v1389_v62, %v1388_v20 }
 0xf10   :  { %v1391_v28 = vrot.slane %v1390_v2, 4 }
 0xf12   :  { %v1392_v1 = vadd.f32 %v1391_v28, %v1390_v2 }
 0xf14   :  { %v1393_v3 = vrot.slane %v1392_v1, 2 }
 0xf16   :  { %v1394_v25 = vadd.f32 %v1393_v3, %v1392_v1 }
 0xf18   :  { %v1395_v6 = vrot.slane %v1394_v25, 1 }
 0xf1a   :  { %v1396_v29 = vadd.f32 %v1395_v6, %v1394_v25 }
 0xf1c   :  { %v1397_v56 = vadd.f32 %v1396_v29, %v2272_v13 }
 0xf1e   :  { %1805 = vtanh.f32 %v1397_v56 }
 0xf24   :  { %v1806_v7 = vpop.eup %1805 }
 0xf25   :  { %v1405_v33 = vsel %vm772_vm2, %v1404_v55, %v1806_v7 }
 0xf26   :  { %v1411_v10 = vpack.c.bf16 %v1405_v33, %v1405_v33 }
 0xf28   :  { %1576 = vmatmul.msk.bf16.vlgmr.msra.gmra.mxu3 %vm128_vm1, %v1411_v10 }
 0xfab   :  { %v1440_v4 = vpop.f32.mrf.mxu3 }
 0xfac   :  { %v1441_v14 = vadd.f32 %v1648_v39, %v1440_v4 }
 0xfae   :  { %v1449_v15 = vmul.f32 %v1649_v32, %v1441_v14 }
 0xfb0   :  { %v1455_v21 = vadd.f32 %v1650_v12, %v1449_v15 }
 0xfb2   :  { %v1457_v16 = vmul.f32 0.70710677, %v1455_v21  ;;  %v1456_v61 = vmul.f32 0.5, %v1455_v21 }
 0xfb3   :  { %v1442_v38 = vpop.f32.mrf.mxu3 }
 0xfb4   :  { %v1458_v22 = vmul.f32 %v1457_v16, %v1457_v16 }
 0xfb6   :  { %v1459_v17 = vmin.f32 %v1458_v22, 16.0 }
 0xfb8   :  { %v1460_v43 = vmul.f32 2.1237322e-06, %v1459_v17  ;;  %v1471_v13 = vmul.f32 3.8918573e-05, %v1459_v17 }
 0xfba   :  { %v1461_v24 = vadd.f32 0.00028619796, %v1460_v43  ;;  %v1472_v19 = vadd.f32 0.001143296, %v1471_v13 }
 0xfbc   :  { %v1462_v11 = vmul.f32 %v1461_v24, %v1459_v17  ;;  %v1473_v34 = vmul.f32 %v1472_v19, %v1459_v17 }
 0xfbe   :  { %v1474_v53 = vadd.f32 0.014752088, %v1473_v34  ;;  %v1463_v54 = vadd.f32 0.0036580483, %v1462_v11 }
 0xfc0   :  { %v1475_v37 = vmul.f32 %v1474_v53, %v1459_v17  ;;  %v1464_v26 = vmul.f32 %v1463_v54, %v1459_v17 }
 0xfc2   :  { %v1476_v8 = vadd.f32 0.112945676, %v1475_v37  ;;  %v1465_v35 = vadd.f32 0.05243302, %v1464_v26 }
 0xfc4   :  { %v1477_v27 = vmul.f32 %v1476_v8, %v1459_v17  ;;  %v1466_v59 = vmul.f32 %v1465_v35, %v1459_v17 }
 0xfc6   :  { %v1478_v31 = vadd.f32 0.4994258, %v1477_v27  ;;  %v1467_v30 = vadd.f32 0.18741608, %v1466_v59 }
 0xfc8   :  { %v1479_v36 = vmul.f32 %v1478_v31, %v1459_v17  ;;  %v1468_v46 = vmul.f32 %v1467_v30, %v1459_v17 }
 0xfca   :  { %v1480_v41 = vadd.f32 1.0, %v1479_v36  ;;  %v1469_v42 = vadd.f32 1.1283791, %v1468_v46 }
 0xfcc   :  { %1807 = vrcp.f32 %v1480_v41  ;;  %v1492_v48 = vand.u32 2147483648, %v1480_v41  ;;  %v1490_v49 = vand.u32 2147483647, %v1480_v41  ;;  %vm1486_vm10 = vweird.f32 %v1480_v41 }
 0xfcd   :  { %v1470_v57 = vmul.f32 %v1469_v42, %v1457_v16 }
 0xfce   :  { %v1493_v55 = vor.u32 1.1754944e-38, %v1492_v48  ;;  %vm1491_vm12 = vcmp.eq.f32.partialorder %v1490_v49, 8.507059e+37 }
 0xfd2   :  { %v1808_v45 = vpop.eup %1807 }
 0xfd3   :  { %v1482_v47 = vmul.f32 %v1808_v45, %v1480_v41  ;;  %vm1487_vm1 = vweird.f32 %v1808_v45 }
 0xfd4   :  { %vm1488_vm11 = vmor %vm1486_vm10, %vm1487_vm1 }
 0xfd5   :  { %v1483_v18 = vsub.f32 1.0, %v1482_v47 }
 0xfd7   :  { %v1484_v44 = vmul.f32 %v1808_v45, %v1483_v18 }
 0xfd9   :  { %v1485_v50 = vadd.f32 %v1808_v45, %v1484_v44 }
 0xfdb   :  { %v1489_v60 = vsel %vm1488_vm11, %v1808_v45, %v1485_v50 }
 0xfdc   :  { %v1494_v58 = vsel %vm1491_vm12, %v1493_v55, %v1489_v60 }
 0xfdd   :  { %v1495_v0 = vmul.f32 %v1494_v58, %v1470_v57 }
 0xfdf   :  { %v1577_v5 = vclamps-f32 %v1495_v0, 1.0 }
 0xfe1   :  { %v1498_v51 = vadd.f32 1.0, %v1577_v5 }
 0xfe3   :  { %v1499_v63 = vmul.f32 %v1498_v51, %v1456_v61 }
 0xfe5   :  { %v1505_v40 = vmul.f32 %v1651_v9, %v1499_v63 }
 0xfe7   :  { %v1506_v23 = vsel %vm111_vm0, %v1505_v40, 0.0 }
 0xfe8   :  { %1507 = vadd.xlane.f32.xlu0 %v1506_v23 }
0x105b   :  { %v1508_v20 = vpop.xlane.xlu0 %1507 }
0x105c   :  { %v1514_v62 = vadd.f32 %v1652_v52, %v1508_v20 }
0x105e   :  { %v1578_v2 = vmul.f32 -1.442695, %v1514_v62 }
0x1060   :  { %1809 = vpow2.f32 %v1578_v2 }
0x1066   :  { %v1810_v28 = vpop.eup %1809 }
0x1067   :  { %v1518_v1 = vadd.f32 1.0, %v1810_v28 }
0x1069   :  { %1811 = vrcp.f32 %v1518_v1  ;;  %v1530_v29 = vand.u32 2147483648, %v1518_v1  ;;  %v1528_v7 = vand.u32 2147483647, %v1518_v1  ;;  %vm1524_vm14 = vweird.f32 %v1518_v1 }
0x106b   :  { %v1531_v10 = vor.u32 1.1754944e-38, %v1530_v29  ;;  %vm1529_vm2 = vcmp.eq.f32.partialorder %v1528_v7, 8.507059e+37 }
0x106f   :  { %v1812_v3 = vpop.eup %1811 }
0x1070   :  { %v1520_v25 = vmul.f32 %v1812_v3, %v1518_v1  ;;  %vm1525_vm13 = vweird.f32 %v1812_v3 }
0x1071   :  { %vm1526_vm0 = vmor %vm1524_vm14, %vm1525_vm13 }
0x1072   :  { %v1521_v6 = vsub.f32 1.0, %v1520_v25 }
0x1074   :  { %v1522_v56 = vmul.f32 %v1812_v3, %v1521_v6 }
0x1076   :  { %v1523_v33 = vadd.f32 %v1812_v3, %v1522_v56 }
0x1078   :  { %v1527_v39 = vsel %vm1526_vm0, %v1812_v3, %v1523_v33 }
0x1079   :  { %v1532_v32 = vsel %vm1529_vm2, %v1531_v10, %v1527_v39 }
0x107a   :  { %1535 = vst.msk [vmem:[%s2475_s5] sm:$0xff] %vm1534_vm15, %v1532_v32 }
0x107b   :  { %1540 = vsyncpa [#allocation3], 1 }
0x107c   :  { %1541 = vsyncpa [#allocation5], 1 }
0x107d   :  { %1542 = vsyncpa [#allocation8], 1 }

</bundles_post_ra>
